<compile_context>
chip_gen: v7x
topology: tpu7x:2x2x1
jax: 0.10.0
libtpu: 0.0.40
codegen_flags: <defaults>
</compile_context>

<pallas_src>
import math
import jax
import jax.numpy as jnp
from jax.experimental import pallas as pl
from jax.experimental.pallas import tpu as pltpu

FM = 16


def spectral_morph_kernel(p_ref, we_ref, wd_ref, wcat_ref, b_ref, out_ref):
    # p_ref   : (K, T)      im2col columns for this (batch, HW tile); K on sublanes, T on lanes
    # we_ref  : (FM, K)     erosion weight
    # wd_ref  : (FM, K)     dilation weight
    # wcat_ref: (FM, 2*FM)  [w1 | w2] of the two 1x1 convs (out-channel major)
    # b_ref   : (FM, 1)     b1 + b2
    # out_ref : (FM, T)
    K = p_ref.shape[0]
    we = we_ref[...]
    wd = wd_ref[...]

    # Morphology hot path: running min / max over the K = C*k*k neighborhood.
    # Each step: sublane-row read of p (cheap) broadcast against a (FM,1) weight
    # column -> fully lane-dense (FM, T) VALU ops.
    p0 = p_ref[0:1, :]                       # (1, T)
    z1 = p0 - we[:, 0:1]                     # (FM, T)  running min of (p - We)
    z2 = p0 + wd[:, 0:1]                     # (FM, T)  running max of (p + Wd)
    for k in range(1, K):
        pk = p_ref[k:k + 1, :]               # (1, T) sublane row
        z1 = jnp.minimum(z1, pk - we[:, k:k + 1])
        z2 = jnp.maximum(z2, pk + wd[:, k:k + 1])

    # Fused 1x1 convs: out = W1 @ z1 + W2 @ z2 + (b1 + b2)  ==  Wcat @ [z1; z2] + bsum
    z = jnp.concatenate([z1, z2], axis=0)    # (2*FM, T)
    y = jnp.dot(wcat_ref[...], z, preferred_element_type=jnp.float32) + b_ref[...]
    out_ref[...] = y.astype(out_ref.dtype)


def unfold_nchw(x, k):
    """nn.Unfold(kernel=k, stride=1, pad=0) on fixed_padding(x, k, 1) -> (B, C*k*k, H*W)."""
    B, C, H, W = x.shape
    pad_total = k - 1
    pb = pad_total // 2
    pe = pad_total - pb
    xp = jnp.pad(x, ((0, 0), (0, 0), (pb, pe), (pb, pe)))
    cols = [xp[:, :, kh:kh + H, kw:kw + W] for kh in range(k) for kw in range(k)]
    patches = jnp.stack(cols, axis=2)                 # (B, C, k*k, H, W): c-major, then kh, kw
    return patches.reshape(B, C * k * k, H * W)       # matches torch unfold column order


def spectral_morph(x, params, kernel=3, max_tile_hw=1024):
    """x: (B, NC, H, W) float32 -> (B, FM, H, W) float32."""
    B, C, H, W = x.shape
    k = kernel
    K = C * k * k
    HW = H * W

    patches = unfold_nchw(x.astype(jnp.float32), k)   # (B, K, HW) — torch unfold order, no transpose

    # Spatial tile on lanes: multiple of 128, up to max_tile_hw; pad HW to a tile multiple.
    tile_hw = min(max_tile_hw, pl.cdiv(HW, 128) * 128)
    hw_pad = pl.cdiv(HW, tile_hw) * tile_hw
    if hw_pad != HW:
        patches = jnp.pad(patches, ((0, 0), (0, 0), (0, hw_pad - HW)))

    we = params["we"].reshape(FM, K).astype(jnp.float32)        # (FM, K)
    wd = params["wd"].reshape(FM, K).astype(jnp.float32)        # (FM, K)
    w1 = params["w1"].reshape(FM, FM).astype(jnp.float32)       # (out, in)
    w2 = params["w2"].reshape(FM, FM).astype(jnp.float32)
    wcat = jnp.concatenate([w1, w2], axis=1)                    # (FM, 2*FM)
    bsum = (params["b1"] + params["b2"]).reshape(FM, 1).astype(jnp.float32)

    grid = (B, hw_pad // tile_hw)                               # >= 2 steps for the test shapes
    const = lambda shape: pl.BlockSpec(shape, lambda b, t: (0, 0))

    out_flat = pl.pallas_call(
        spectral_morph_kernel,
        out_shape=jax.ShapeDtypeStruct((B, FM, hw_pad), jnp.float32),
        grid_spec=pltpu.PrefetchScalarGridSpec(
            num_scalar_prefetch=0,
            grid=grid,
            in_specs=[
                pl.BlockSpec((None, K, tile_hw), lambda b, t: (b, 0, t)),  # patches: (K, T) per step
                const((FM, K)),        # erosion weight (resident)
                const((FM, K)),        # dilation weight
                const((FM, 2 * FM)),   # fused 1x1 conv weight
                const((FM, 1)),        # fused bias
            ],
            out_specs=pl.BlockSpec((None, FM, tile_hw), lambda b, t: (b, 0, t)),
        ),
        compiler_params=pltpu.CompilerParams(
            dimension_semantics=("parallel", "parallel")),
    )(patches, we, wd, wcat, bsum)

    # Output is already channel-major: just drop HW padding and reshape to NCHW.
    out = out_flat[:, :, :HW].reshape(B, FM, H, W)
    return out


def spectral_morph_ref(x, params, kernel=3):
    """Pure-JAX reference mirroring the PyTorch module (soft_max=False)."""
    B, C, H, W = x.shape
    k = kernel
    K = C * k * k
    patches = unfold_nchw(x, k)                                       # (B, K, HW)
    we = params["we"].reshape(FM, K)
    wd = params["wd"].reshape(FM, K)
    # erosion: -max_k(we - p) ; dilation: max_k(wd + p)
    z1 = -jnp.max(we[None, :, :, None] - patches[:, None, :, :], axis=2)   # (B, FM, HW)
    z2 = jnp.max(wd[None, :, :, None] + patches[:, None, :, :], axis=2)    # (B, FM, HW)
    w1 = params["w1"].reshape(FM, FM)
    w2 = params["w2"].reshape(FM, FM)
    y1 = jnp.einsum("oi,bil->bol", w1, z1) + params["b1"][None, :, None]
    y2 = jnp.einsum("oi,bil->bol", w2, z2) + params["b2"][None, :, None]
    return (y1 + y2).reshape(B, FM, H, W)


def init_params(key, NC, kernel=3):
    # Module shapes: Morphology weight (FM, NC, k, k); Conv2d(FM, FM, 1) weight (FM, FM, 1, 1), bias (FM,).
    # (PyTorch inits morphology weights to zeros; we use small deterministic random values
    #  so the kernel exercises the full computation.)
    k1, k2, k3, k4, k5, k6 = jax.random.split(key, 6)
    fan = FM
    bound = 1.0 / math.sqrt(fan)
    return {
        "we": 0.1 * jax.random.normal(k1, (FM, NC, kernel, kernel), jnp.float32),
        "wd": 0.1 * jax.random.normal(k2, (FM, NC, kernel, kernel), jnp.float32),
        "w1": jax.random.uniform(k3, (FM, FM, 1, 1), jnp.float32, -bound, bound),
        "b1": jax.random.uniform(k4, (FM,), jnp.float32, -bound, bound),
        "w2": jax.random.uniform(k5, (FM, FM, 1, 1), jnp.float32, -bound, bound),
        "b2": jax.random.uniform(k6, (FM,), jnp.float32, -bound, bound),
    }


if __name__ == "__main__":
    key = jax.random.PRNGKey(0)
    B, NC, H, W = 2, 4, 16, 16
    kernel = 3

    kx, kp = jax.random.split(key)
    x = jax.random.normal(kx, (B, NC, H, W), jnp.float32)
    params = init_params(kp, NC, kernel)

    out = jax.block_until_ready(spectral_morph(x, params, kernel=kernel))
    ref = jax.block_until_ready(spectral_morph_ref(x, params, kernel=kernel))

    assert out.shape == (B, FM, H, W)
    err = float(jnp.max(jnp.abs(out - ref)))
    assert jnp.allclose(out, ref, atol=1e-5, rtol=1e-5), err
    print("KERNEL_OK")
</pallas_src>

<mosaic_0001>
module attributes {stable_mosaic.version = 11 : i64} {
  func.func @spectral_morph_kernel(%arg0: i32, %arg1: i32, %arg2: memref<1x36x256xf32, #tpu.memory_space<vmem>>, %arg3: memref<16x36xf32, #tpu.memory_space<vmem>>, %arg4: memref<16x36xf32, #tpu.memory_space<vmem>>, %arg5: memref<16x32xf32, #tpu.memory_space<vmem>>, %arg6: memref<16x1xf32, #tpu.memory_space<vmem>>, %arg7: memref<1x16x256xf32, #tpu.memory_space<vmem>>) attributes {dimension_semantics = [#tpu.dimension_semantics<parallel>, #tpu.dimension_semantics<parallel>], iteration_bounds = array<i64: 2, 1>, scalar_prefetch = 0 : i64, scratch_operands = 0 : i64, tpu.core_type = #tpu.core_type<tc>, window_params = [{transform_indices = @transform_0, window_bounds = array<i64: 1, 36, 256>}, {pipeline_mode = #tpu.pipeline_mode<synchronous>, transform_indices = @transform_1, window_bounds = array<i64: 16, 36>}, {pipeline_mode = #tpu.pipeline_mode<synchronous>, transform_indices = @transform_2, window_bounds = array<i64: 16, 36>}, {pipeline_mode = #tpu.pipeline_mode<synchronous>, transform_indices = @transform_3, window_bounds = array<i64: 16, 32>}, {pipeline_mode = #tpu.pipeline_mode<synchronous>, transform_indices = @transform_4, window_bounds = array<i64: 16, 1>}, {transform_indices = @transform_5, window_bounds = array<i64: 1, 16, 256>}]} {
    %c0 = arith.constant 0 : index
    %c0_0 = arith.constant 0 : index
    %0 = vector.load %arg3[%c0, %c0_0] : memref<16x36xf32, #tpu.memory_space<vmem>>, vector<16x36xf32>
    %c0_1 = arith.constant 0 : index
    %c0_2 = arith.constant 0 : index
    %1 = vector.load %arg4[%c0_1, %c0_2] : memref<16x36xf32, #tpu.memory_space<vmem>>, vector<16x36xf32>
    %c0_3 = arith.constant 0 : index
    %c0_4 = arith.constant 0 : index
    %c0_5 = arith.constant 0 : index
    %2 = vector.load %arg2[%c0_3, %c0_4, %c0_5] : memref<1x36x256xf32, #tpu.memory_space<vmem>>, vector<1x1x256xf32>
    %3 = vector.shape_cast %2 : vector<1x1x256xf32> to vector<1x256xf32>
    %4 = vector.extract_strided_slice %0 {offsets = [0, 0], sizes = [16, 1], strides = [1, 1]} : vector<16x36xf32> to vector<16x1xf32>
    %5 = vector.broadcast %3 : vector<1x256xf32> to vector<16x256xf32>
    %6 = vector.broadcast %4 : vector<16x1xf32> to vector<16x256xf32>
    %7 = arith.subf %5, %6 : vector<16x256xf32>
    %8 = vector.extract_strided_slice %1 {offsets = [0, 0], sizes = [16, 1], strides = [1, 1]} : vector<16x36xf32> to vector<16x1xf32>
    %9 = vector.broadcast %3 : vector<1x256xf32> to vector<16x256xf32>
    %10 = vector.broadcast %8 : vector<16x1xf32> to vector<16x256xf32>
    %11 = arith.addf %9, %10 : vector<16x256xf32>
    %c0_6 = arith.constant 0 : index
    %c1 = arith.constant 1 : index
    %c0_7 = arith.constant 0 : index
    %12 = vector.load %arg2[%c0_6, %c1, %c0_7] : memref<1x36x256xf32, #tpu.memory_space<vmem>>, vector<1x1x256xf32>
    %13 = vector.shape_cast %12 : vector<1x1x256xf32> to vector<1x256xf32>
    %14 = vector.extract_strided_slice %0 {offsets = [0, 1], sizes = [16, 1], strides = [1, 1]} : vector<16x36xf32> to vector<16x1xf32>
    %15 = vector.broadcast %13 : vector<1x256xf32> to vector<16x256xf32>
    %16 = vector.broadcast %14 : vector<16x1xf32> to vector<16x256xf32>
    %17 = arith.subf %15, %16 : vector<16x256xf32>
    %18 = arith.minimumf %7, %17 : vector<16x256xf32>
    %19 = vector.extract_strided_slice %1 {offsets = [0, 1], sizes = [16, 1], strides = [1, 1]} : vector<16x36xf32> to vector<16x1xf32>
    %20 = vector.broadcast %13 : vector<1x256xf32> to vector<16x256xf32>
    %21 = vector.broadcast %19 : vector<16x1xf32> to vector<16x256xf32>
    %22 = arith.addf %20, %21 : vector<16x256xf32>
    %23 = arith.maximumf %11, %22 : vector<16x256xf32>
    %c0_8 = arith.constant 0 : index
    %c2 = arith.constant 2 : index
    %c0_9 = arith.constant 0 : index
    %24 = vector.load %arg2[%c0_8, %c2, %c0_9] : memref<1x36x256xf32, #tpu.memory_space<vmem>>, vector<1x1x256xf32>
    %25 = vector.shape_cast %24 : vector<1x1x256xf32> to vector<1x256xf32>
    %26 = vector.extract_strided_slice %0 {offsets = [0, 2], sizes = [16, 1], strides = [1, 1]} : vector<16x36xf32> to vector<16x1xf32>
    %27 = vector.broadcast %25 : vector<1x256xf32> to vector<16x256xf32>
    %28 = vector.broadcast %26 : vector<16x1xf32> to vector<16x256xf32>
    %29 = arith.subf %27, %28 : vector<16x256xf32>
    %30 = arith.minimumf %18, %29 : vector<16x256xf32>
    %31 = vector.extract_strided_slice %1 {offsets = [0, 2], sizes = [16, 1], strides = [1, 1]} : vector<16x36xf32> to vector<16x1xf32>
    %32 = vector.broadcast %25 : vector<1x256xf32> to vector<16x256xf32>
    %33 = vector.broadcast %31 : vector<16x1xf32> to vector<16x256xf32>
    %34 = arith.addf %32, %33 : vector<16x256xf32>
    %35 = arith.maximumf %23, %34 : vector<16x256xf32>
    %c0_10 = arith.constant 0 : index
    %c3 = arith.constant 3 : index
    %c0_11 = arith.constant 0 : index
    %36 = vector.load %arg2[%c0_10, %c3, %c0_11] : memref<1x36x256xf32, #tpu.memory_space<vmem>>, vector<1x1x256xf32>
    %37 = vector.shape_cast %36 : vector<1x1x256xf32> to vector<1x256xf32>
    %38 = vector.extract_strided_slice %0 {offsets = [0, 3], sizes = [16, 1], strides = [1, 1]} : vector<16x36xf32> to vector<16x1xf32>
    %39 = vector.broadcast %37 : vector<1x256xf32> to vector<16x256xf32>
    %40 = vector.broadcast %38 : vector<16x1xf32> to vector<16x256xf32>
    %41 = arith.subf %39, %40 : vector<16x256xf32>
    %42 = arith.minimumf %30, %41 : vector<16x256xf32>
    %43 = vector.extract_strided_slice %1 {offsets = [0, 3], sizes = [16, 1], strides = [1, 1]} : vector<16x36xf32> to vector<16x1xf32>
    %44 = vector.broadcast %37 : vector<1x256xf32> to vector<16x256xf32>
    %45 = vector.broadcast %43 : vector<16x1xf32> to vector<16x256xf32>
    %46 = arith.addf %44, %45 : vector<16x256xf32>
    %47 = arith.maximumf %35, %46 : vector<16x256xf32>
    %c0_12 = arith.constant 0 : index
    %c4 = arith.constant 4 : index
    %c0_13 = arith.constant 0 : index
    %48 = vector.load %arg2[%c0_12, %c4, %c0_13] : memref<1x36x256xf32, #tpu.memory_space<vmem>>, vector<1x1x256xf32>
    %49 = vector.shape_cast %48 : vector<1x1x256xf32> to vector<1x256xf32>
    %50 = vector.extract_strided_slice %0 {offsets = [0, 4], sizes = [16, 1], strides = [1, 1]} : vector<16x36xf32> to vector<16x1xf32>
    %51 = vector.broadcast %49 : vector<1x256xf32> to vector<16x256xf32>
    %52 = vector.broadcast %50 : vector<16x1xf32> to vector<16x256xf32>
    %53 = arith.subf %51, %52 : vector<16x256xf32>
    %54 = arith.minimumf %42, %53 : vector<16x256xf32>
    %55 = vector.extract_strided_slice %1 {offsets = [0, 4], sizes = [16, 1], strides = [1, 1]} : vector<16x36xf32> to vector<16x1xf32>
    %56 = vector.broadcast %49 : vector<1x256xf32> to vector<16x256xf32>
    %57 = vector.broadcast %55 : vector<16x1xf32> to vector<16x256xf32>
    %58 = arith.addf %56, %57 : vector<16x256xf32>
    %59 = arith.maximumf %47, %58 : vector<16x256xf32>
    %c0_14 = arith.constant 0 : index
    %c5 = arith.constant 5 : index
    %c0_15 = arith.constant 0 : index
    %60 = vector.load %arg2[%c0_14, %c5, %c0_15] : memref<1x36x256xf32, #tpu.memory_space<vmem>>, vector<1x1x256xf32>
    %61 = vector.shape_cast %60 : vector<1x1x256xf32> to vector<1x256xf32>
    %62 = vector.extract_strided_slice %0 {offsets = [0, 5], sizes = [16, 1], strides = [1, 1]} : vector<16x36xf32> to vector<16x1xf32>
    %63 = vector.broadcast %61 : vector<1x256xf32> to vector<16x256xf32>
    %64 = vector.broadcast %62 : vector<16x1xf32> to vector<16x256xf32>
    %65 = arith.subf %63, %64 : vector<16x256xf32>
    %66 = arith.minimumf %54, %65 : vector<16x256xf32>
    %67 = vector.extract_strided_slice %1 {offsets = [0, 5], sizes = [16, 1], strides = [1, 1]} : vector<16x36xf32> to vector<16x1xf32>
    %68 = vector.broadcast %61 : vector<1x256xf32> to vector<16x256xf32>
    %69 = vector.broadcast %67 : vector<16x1xf32> to vector<16x256xf32>
    %70 = arith.addf %68, %69 : vector<16x256xf32>
    %71 = arith.maximumf %59, %70 : vector<16x256xf32>
    %c0_16 = arith.constant 0 : index
    %c6 = arith.constant 6 : index
    %c0_17 = arith.constant 0 : index
    %72 = vector.load %arg2[%c0_16, %c6, %c0_17] : memref<1x36x256xf32, #tpu.memory_space<vmem>>, vector<1x1x256xf32>
    %73 = vector.shape_cast %72 : vector<1x1x256xf32> to vector<1x256xf32>
    %74 = vector.extract_strided_slice %0 {offsets = [0, 6], sizes = [16, 1], strides = [1, 1]} : vector<16x36xf32> to vector<16x1xf32>
    %75 = vector.broadcast %73 : vector<1x256xf32> to vector<16x256xf32>
    %76 = vector.broadcast %74 : vector<16x1xf32> to vector<16x256xf32>
    %77 = arith.subf %75, %76 : vector<16x256xf32>
    %78 = arith.minimumf %66, %77 : vector<16x256xf32>
    %79 = vector.extract_strided_slice %1 {offsets = [0, 6], sizes = [16, 1], strides = [1, 1]} : vector<16x36xf32> to vector<16x1xf32>
    %80 = vector.broadcast %73 : vector<1x256xf32> to vector<16x256xf32>
    %81 = vector.broadcast %79 : vector<16x1xf32> to vector<16x256xf32>
    %82 = arith.addf %80, %81 : vector<16x256xf32>
    %83 = arith.maximumf %71, %82 : vector<16x256xf32>
    %c0_18 = arith.constant 0 : index
    %c7 = arith.constant 7 : index
    %c0_19 = arith.constant 0 : index
    %84 = vector.load %arg2[%c0_18, %c7, %c0_19] : memref<1x36x256xf32, #tpu.memory_space<vmem>>, vector<1x1x256xf32>
    %85 = vector.shape_cast %84 : vector<1x1x256xf32> to vector<1x256xf32>
    %86 = vector.extract_strided_slice %0 {offsets = [0, 7], sizes = [16, 1], strides = [1, 1]} : vector<16x36xf32> to vector<16x1xf32>
    %87 = vector.broadcast %85 : vector<1x256xf32> to vector<16x256xf32>
    %88 = vector.broadcast %86 : vector<16x1xf32> to vector<16x256xf32>
    %89 = arith.subf %87, %88 : vector<16x256xf32>
    %90 = arith.minimumf %78, %89 : vector<16x256xf32>
    %91 = vector.extract_strided_slice %1 {offsets = [0, 7], sizes = [16, 1], strides = [1, 1]} : vector<16x36xf32> to vector<16x1xf32>
    %92 = vector.broadcast %85 : vector<1x256xf32> to vector<16x256xf32>
    %93 = vector.broadcast %91 : vector<16x1xf32> to vector<16x256xf32>
    %94 = arith.addf %92, %93 : vector<16x256xf32>
    %95 = arith.maximumf %83, %94 : vector<16x256xf32>
    %c0_20 = arith.constant 0 : index
    %c8 = arith.constant 8 : index
    %c0_21 = arith.constant 0 : index
    %96 = vector.load %arg2[%c0_20, %c8, %c0_21] : memref<1x36x256xf32, #tpu.memory_space<vmem>>, vector<1x1x256xf32>
    %97 = vector.shape_cast %96 : vector<1x1x256xf32> to vector<1x256xf32>
    %98 = vector.extract_strided_slice %0 {offsets = [0, 8], sizes = [16, 1], strides = [1, 1]} : vector<16x36xf32> to vector<16x1xf32>
    %99 = vector.broadcast %97 : vector<1x256xf32> to vector<16x256xf32>
    %100 = vector.broadcast %98 : vector<16x1xf32> to vector<16x256xf32>
    %101 = arith.subf %99, %100 : vector<16x256xf32>
    %102 = arith.minimumf %90, %101 : vector<16x256xf32>
    %103 = vector.extract_strided_slice %1 {offsets = [0, 8], sizes = [16, 1], strides = [1, 1]} : vector<16x36xf32> to vector<16x1xf32>
    %104 = vector.broadcast %97 : vector<1x256xf32> to vector<16x256xf32>
    %105 = vector.broadcast %103 : vector<16x1xf32> to vector<16x256xf32>
    %106 = arith.addf %104, %105 : vector<16x256xf32>
    %107 = arith.maximumf %95, %106 : vector<16x256xf32>
    %c0_22 = arith.constant 0 : index
    %c9 = arith.constant 9 : index
    %c0_23 = arith.constant 0 : index
    %108 = vector.load %arg2[%c0_22, %c9, %c0_23] : memref<1x36x256xf32, #tpu.memory_space<vmem>>, vector<1x1x256xf32>
    %109 = vector.shape_cast %108 : vector<1x1x256xf32> to vector<1x256xf32>
    %110 = vector.extract_strided_slice %0 {offsets = [0, 9], sizes = [16, 1], strides = [1, 1]} : vector<16x36xf32> to vector<16x1xf32>
    %111 = vector.broadcast %109 : vector<1x256xf32> to vector<16x256xf32>
    %112 = vector.broadcast %110 : vector<16x1xf32> to vector<16x256xf32>
    %113 = arith.subf %111, %112 : vector<16x256xf32>
    %114 = arith.minimumf %102, %113 : vector<16x256xf32>
    %115 = vector.extract_strided_slice %1 {offsets = [0, 9], sizes = [16, 1], strides = [1, 1]} : vector<16x36xf32> to vector<16x1xf32>
    %116 = vector.broadcast %109 : vector<1x256xf32> to vector<16x256xf32>
    %117 = vector.broadcast %115 : vector<16x1xf32> to vector<16x256xf32>
    %118 = arith.addf %116, %117 : vector<16x256xf32>
    %119 = arith.maximumf %107, %118 : vector<16x256xf32>
    %c0_24 = arith.constant 0 : index
    %c10 = arith.constant 10 : index
    %c0_25 = arith.constant 0 : index
    %120 = vector.load %arg2[%c0_24, %c10, %c0_25] : memref<1x36x256xf32, #tpu.memory_space<vmem>>, vector<1x1x256xf32>
    %121 = vector.shape_cast %120 : vector<1x1x256xf32> to vector<1x256xf32>
    %122 = vector.extract_strided_slice %0 {offsets = [0, 10], sizes = [16, 1], strides = [1, 1]} : vector<16x36xf32> to vector<16x1xf32>
    %123 = vector.broadcast %121 : vector<1x256xf32> to vector<16x256xf32>
    %124 = vector.broadcast %122 : vector<16x1xf32> to vector<16x256xf32>
    %125 = arith.subf %123, %124 : vector<16x256xf32>
    %126 = arith.minimumf %114, %125 : vector<16x256xf32>
    %127 = vector.extract_strided_slice %1 {offsets = [0, 10], sizes = [16, 1], strides = [1, 1]} : vector<16x36xf32> to vector<16x1xf32>
    %128 = vector.broadcast %121 : vector<1x256xf32> to vector<16x256xf32>
    %129 = vector.broadcast %127 : vector<16x1xf32> to vector<16x256xf32>
    %130 = arith.addf %128, %129 : vector<16x256xf32>
    %131 = arith.maximumf %119, %130 : vector<16x256xf32>
    %c0_26 = arith.constant 0 : index
    %c11 = arith.constant 11 : index
    %c0_27 = arith.constant 0 : index
    %132 = vector.load %arg2[%c0_26, %c11, %c0_27] : memref<1x36x256xf32, #tpu.memory_space<vmem>>, vector<1x1x256xf32>
    %133 = vector.shape_cast %132 : vector<1x1x256xf32> to vector<1x256xf32>
    %134 = vector.extract_strided_slice %0 {offsets = [0, 11], sizes = [16, 1], strides = [1, 1]} : vector<16x36xf32> to vector<16x1xf32>
    %135 = vector.broadcast %133 : vector<1x256xf32> to vector<16x256xf32>
    %136 = vector.broadcast %134 : vector<16x1xf32> to vector<16x256xf32>
    %137 = arith.subf %135, %136 : vector<16x256xf32>
    %138 = arith.minimumf %126, %137 : vector<16x256xf32>
    %139 = vector.extract_strided_slice %1 {offsets = [0, 11], sizes = [16, 1], strides = [1, 1]} : vector<16x36xf32> to vector<16x1xf32>
    %140 = vector.broadcast %133 : vector<1x256xf32> to vector<16x256xf32>
    %141 = vector.broadcast %139 : vector<16x1xf32> to vector<16x256xf32>
    %142 = arith.addf %140, %141 : vector<16x256xf32>
    %143 = arith.maximumf %131, %142 : vector<16x256xf32>
    %c0_28 = arith.constant 0 : index
    %c12 = arith.constant 12 : index
    %c0_29 = arith.constant 0 : index
    %144 = vector.load %arg2[%c0_28, %c12, %c0_29] : memref<1x36x256xf32, #tpu.memory_space<vmem>>, vector<1x1x256xf32>
    %145 = vector.shape_cast %144 : vector<1x1x256xf32> to vector<1x256xf32>
    %146 = vector.extract_strided_slice %0 {offsets = [0, 12], sizes = [16, 1], strides = [1, 1]} : vector<16x36xf32> to vector<16x1xf32>
    %147 = vector.broadcast %145 : vector<1x256xf32> to vector<16x256xf32>
    %148 = vector.broadcast %146 : vector<16x1xf32> to vector<16x256xf32>
    %149 = arith.subf %147, %148 : vector<16x256xf32>
    %150 = arith.minimumf %138, %149 : vector<16x256xf32>
    %151 = vector.extract_strided_slice %1 {offsets = [0, 12], sizes = [16, 1], strides = [1, 1]} : vector<16x36xf32> to vector<16x1xf32>
    %152 = vector.broadcast %145 : vector<1x256xf32> to vector<16x256xf32>
    %153 = vector.broadcast %151 : vector<16x1xf32> to vector<16x256xf32>
    %154 = arith.addf %152, %153 : vector<16x256xf32>
    %155 = arith.maximumf %143, %154 : vector<16x256xf32>
    %c0_30 = arith.constant 0 : index
    %c13 = arith.constant 13 : index
    %c0_31 = arith.constant 0 : index
    %156 = vector.load %arg2[%c0_30, %c13, %c0_31] : memref<1x36x256xf32, #tpu.memory_space<vmem>>, vector<1x1x256xf32>
    %157 = vector.shape_cast %156 : vector<1x1x256xf32> to vector<1x256xf32>
    %158 = vector.extract_strided_slice %0 {offsets = [0, 13], sizes = [16, 1], strides = [1, 1]} : vector<16x36xf32> to vector<16x1xf32>
    %159 = vector.broadcast %157 : vector<1x256xf32> to vector<16x256xf32>
    %160 = vector.broadcast %158 : vector<16x1xf32> to vector<16x256xf32>
    %161 = arith.subf %159, %160 : vector<16x256xf32>
    %162 = arith.minimumf %150, %161 : vector<16x256xf32>
    %163 = vector.extract_strided_slice %1 {offsets = [0, 13], sizes = [16, 1], strides = [1, 1]} : vector<16x36xf32> to vector<16x1xf32>
    %164 = vector.broadcast %157 : vector<1x256xf32> to vector<16x256xf32>
    %165 = vector.broadcast %163 : vector<16x1xf32> to vector<16x256xf32>
    %166 = arith.addf %164, %165 : vector<16x256xf32>
    %167 = arith.maximumf %155, %166 : vector<16x256xf32>
    %c0_32 = arith.constant 0 : index
    %c14 = arith.constant 14 : index
    %c0_33 = arith.constant 0 : index
    %168 = vector.load %arg2[%c0_32, %c14, %c0_33] : memref<1x36x256xf32, #tpu.memory_space<vmem>>, vector<1x1x256xf32>
    %169 = vector.shape_cast %168 : vector<1x1x256xf32> to vector<1x256xf32>
    %170 = vector.extract_strided_slice %0 {offsets = [0, 14], sizes = [16, 1], strides = [1, 1]} : vector<16x36xf32> to vector<16x1xf32>
    %171 = vector.broadcast %169 : vector<1x256xf32> to vector<16x256xf32>
    %172 = vector.broadcast %170 : vector<16x1xf32> to vector<16x256xf32>
    %173 = arith.subf %171, %172 : vector<16x256xf32>
    %174 = arith.minimumf %162, %173 : vector<16x256xf32>
    %175 = vector.extract_strided_slice %1 {offsets = [0, 14], sizes = [16, 1], strides = [1, 1]} : vector<16x36xf32> to vector<16x1xf32>
    %176 = vector.broadcast %169 : vector<1x256xf32> to vector<16x256xf32>
    %177 = vector.broadcast %175 : vector<16x1xf32> to vector<16x256xf32>
    %178 = arith.addf %176, %177 : vector<16x256xf32>
    %179 = arith.maximumf %167, %178 : vector<16x256xf32>
    %c0_34 = arith.constant 0 : index
    %c15 = arith.constant 15 : index
    %c0_35 = arith.constant 0 : index
    %180 = vector.load %arg2[%c0_34, %c15, %c0_35] : memref<1x36x256xf32, #tpu.memory_space<vmem>>, vector<1x1x256xf32>
    %181 = vector.shape_cast %180 : vector<1x1x256xf32> to vector<1x256xf32>
    %182 = vector.extract_strided_slice %0 {offsets = [0, 15], sizes = [16, 1], strides = [1, 1]} : vector<16x36xf32> to vector<16x1xf32>
    %183 = vector.broadcast %181 : vector<1x256xf32> to vector<16x256xf32>
    %184 = vector.broadcast %182 : vector<16x1xf32> to vector<16x256xf32>
    %185 = arith.subf %183, %184 : vector<16x256xf32>
    %186 = arith.minimumf %174, %185 : vector<16x256xf32>
    %187 = vector.extract_strided_slice %1 {offsets = [0, 15], sizes = [16, 1], strides = [1, 1]} : vector<16x36xf32> to vector<16x1xf32>
    %188 = vector.broadcast %181 : vector<1x256xf32> to vector<16x256xf32>
    %189 = vector.broadcast %187 : vector<16x1xf32> to vector<16x256xf32>
    %190 = arith.addf %188, %189 : vector<16x256xf32>
    %191 = arith.maximumf %179, %190 : vector<16x256xf32>
    %c0_36 = arith.constant 0 : index
    %c16 = arith.constant 16 : index
    %c0_37 = arith.constant 0 : index
    %192 = vector.load %arg2[%c0_36, %c16, %c0_37] : memref<1x36x256xf32, #tpu.memory_space<vmem>>, vector<1x1x256xf32>
    %193 = vector.shape_cast %192 : vector<1x1x256xf32> to vector<1x256xf32>
    %194 = vector.extract_strided_slice %0 {offsets = [0, 16], sizes = [16, 1], strides = [1, 1]} : vector<16x36xf32> to vector<16x1xf32>
    %195 = vector.broadcast %193 : vector<1x256xf32> to vector<16x256xf32>
    %196 = vector.broadcast %194 : vector<16x1xf32> to vector<16x256xf32>
    %197 = arith.subf %195, %196 : vector<16x256xf32>
    %198 = arith.minimumf %186, %197 : vector<16x256xf32>
    %199 = vector.extract_strided_slice %1 {offsets = [0, 16], sizes = [16, 1], strides = [1, 1]} : vector<16x36xf32> to vector<16x1xf32>
    %200 = vector.broadcast %193 : vector<1x256xf32> to vector<16x256xf32>
    %201 = vector.broadcast %199 : vector<16x1xf32> to vector<16x256xf32>
    %202 = arith.addf %200, %201 : vector<16x256xf32>
    %203 = arith.maximumf %191, %202 : vector<16x256xf32>
    %c0_38 = arith.constant 0 : index
    %c17 = arith.constant 17 : index
    %c0_39 = arith.constant 0 : index
    %204 = vector.load %arg2[%c0_38, %c17, %c0_39] : memref<1x36x256xf32, #tpu.memory_space<vmem>>, vector<1x1x256xf32>
    %205 = vector.shape_cast %204 : vector<1x1x256xf32> to vector<1x256xf32>
    %206 = vector.extract_strided_slice %0 {offsets = [0, 17], sizes = [16, 1], strides = [1, 1]} : vector<16x36xf32> to vector<16x1xf32>
    %207 = vector.broadcast %205 : vector<1x256xf32> to vector<16x256xf32>
    %208 = vector.broadcast %206 : vector<16x1xf32> to vector<16x256xf32>
    %209 = arith.subf %207, %208 : vector<16x256xf32>
    %210 = arith.minimumf %198, %209 : vector<16x256xf32>
    %211 = vector.extract_strided_slice %1 {offsets = [0, 17], sizes = [16, 1], strides = [1, 1]} : vector<16x36xf32> to vector<16x1xf32>
    %212 = vector.broadcast %205 : vector<1x256xf32> to vector<16x256xf32>
    %213 = vector.broadcast %211 : vector<16x1xf32> to vector<16x256xf32>
    %214 = arith.addf %212, %213 : vector<16x256xf32>
    %215 = arith.maximumf %203, %214 : vector<16x256xf32>
    %c0_40 = arith.constant 0 : index
    %c18 = arith.constant 18 : index
    %c0_41 = arith.constant 0 : index
    %216 = vector.load %arg2[%c0_40, %c18, %c0_41] : memref<1x36x256xf32, #tpu.memory_space<vmem>>, vector<1x1x256xf32>
    %217 = vector.shape_cast %216 : vector<1x1x256xf32> to vector<1x256xf32>
    %218 = vector.extract_strided_slice %0 {offsets = [0, 18], sizes = [16, 1], strides = [1, 1]} : vector<16x36xf32> to vector<16x1xf32>
    %219 = vector.broadcast %217 : vector<1x256xf32> to vector<16x256xf32>
    %220 = vector.broadcast %218 : vector<16x1xf32> to vector<16x256xf32>
    %221 = arith.subf %219, %220 : vector<16x256xf32>
    %222 = arith.minimumf %210, %221 : vector<16x256xf32>
    %223 = vector.extract_strided_slice %1 {offsets = [0, 18], sizes = [16, 1], strides = [1, 1]} : vector<16x36xf32> to vector<16x1xf32>
    %224 = vector.broadcast %217 : vector<1x256xf32> to vector<16x256xf32>
    %225 = vector.broadcast %223 : vector<16x1xf32> to vector<16x256xf32>
    %226 = arith.addf %224, %225 : vector<16x256xf32>
    %227 = arith.maximumf %215, %226 : vector<16x256xf32>
    %c0_42 = arith.constant 0 : index
    %c19 = arith.constant 19 : index
    %c0_43 = arith.constant 0 : index
    %228 = vector.load %arg2[%c0_42, %c19, %c0_43] : memref<1x36x256xf32, #tpu.memory_space<vmem>>, vector<1x1x256xf32>
    %229 = vector.shape_cast %228 : vector<1x1x256xf32> to vector<1x256xf32>
    %230 = vector.extract_strided_slice %0 {offsets = [0, 19], sizes = [16, 1], strides = [1, 1]} : vector<16x36xf32> to vector<16x1xf32>
    %231 = vector.broadcast %229 : vector<1x256xf32> to vector<16x256xf32>
    %232 = vector.broadcast %230 : vector<16x1xf32> to vector<16x256xf32>
    %233 = arith.subf %231, %232 : vector<16x256xf32>
    %234 = arith.minimumf %222, %233 : vector<16x256xf32>
    %235 = vector.extract_strided_slice %1 {offsets = [0, 19], sizes = [16, 1], strides = [1, 1]} : vector<16x36xf32> to vector<16x1xf32>
    %236 = vector.broadcast %229 : vector<1x256xf32> to vector<16x256xf32>
    %237 = vector.broadcast %235 : vector<16x1xf32> to vector<16x256xf32>
    %238 = arith.addf %236, %237 : vector<16x256xf32>
    %239 = arith.maximumf %227, %238 : vector<16x256xf32>
    %c0_44 = arith.constant 0 : index
    %c20 = arith.constant 20 : index
    %c0_45 = arith.constant 0 : index
    %240 = vector.load %arg2[%c0_44, %c20, %c0_45] : memref<1x36x256xf32, #tpu.memory_space<vmem>>, vector<1x1x256xf32>
    %241 = vector.shape_cast %240 : vector<1x1x256xf32> to vector<1x256xf32>
    %242 = vector.extract_strided_slice %0 {offsets = [0, 20], sizes = [16, 1], strides = [1, 1]} : vector<16x36xf32> to vector<16x1xf32>
    %243 = vector.broadcast %241 : vector<1x256xf32> to vector<16x256xf32>
    %244 = vector.broadcast %242 : vector<16x1xf32> to vector<16x256xf32>
    %245 = arith.subf %243, %244 : vector<16x256xf32>
    %246 = arith.minimumf %234, %245 : vector<16x256xf32>
    %247 = vector.extract_strided_slice %1 {offsets = [0, 20], sizes = [16, 1], strides = [1, 1]} : vector<16x36xf32> to vector<16x1xf32>
    %248 = vector.broadcast %241 : vector<1x256xf32> to vector<16x256xf32>
    %249 = vector.broadcast %247 : vector<16x1xf32> to vector<16x256xf32>
    %250 = arith.addf %248, %249 : vector<16x256xf32>
    %251 = arith.maximumf %239, %250 : vector<16x256xf32>
    %c0_46 = arith.constant 0 : index
    %c21 = arith.constant 21 : index
    %c0_47 = arith.constant 0 : index
    %252 = vector.load %arg2[%c0_46, %c21, %c0_47] : memref<1x36x256xf32, #tpu.memory_space<vmem>>, vector<1x1x256xf32>
    %253 = vector.shape_cast %252 : vector<1x1x256xf32> to vector<1x256xf32>
    %254 = vector.extract_strided_slice %0 {offsets = [0, 21], sizes = [16, 1], strides = [1, 1]} : vector<16x36xf32> to vector<16x1xf32>
    %255 = vector.broadcast %253 : vector<1x256xf32> to vector<16x256xf32>
    %256 = vector.broadcast %254 : vector<16x1xf32> to vector<16x256xf32>
    %257 = arith.subf %255, %256 : vector<16x256xf32>
    %258 = arith.minimumf %246, %257 : vector<16x256xf32>
    %259 = vector.extract_strided_slice %1 {offsets = [0, 21], sizes = [16, 1], strides = [1, 1]} : vector<16x36xf32> to vector<16x1xf32>
    %260 = vector.broadcast %253 : vector<1x256xf32> to vector<16x256xf32>
    %261 = vector.broadcast %259 : vector<16x1xf32> to vector<16x256xf32>
    %262 = arith.addf %260, %261 : vector<16x256xf32>
    %263 = arith.maximumf %251, %262 : vector<16x256xf32>
    %c0_48 = arith.constant 0 : index
    %c22 = arith.constant 22 : index
    %c0_49 = arith.constant 0 : index
    %264 = vector.load %arg2[%c0_48, %c22, %c0_49] : memref<1x36x256xf32, #tpu.memory_space<vmem>>, vector<1x1x256xf32>
    %265 = vector.shape_cast %264 : vector<1x1x256xf32> to vector<1x256xf32>
    %266 = vector.extract_strided_slice %0 {offsets = [0, 22], sizes = [16, 1], strides = [1, 1]} : vector<16x36xf32> to vector<16x1xf32>
    %267 = vector.broadcast %265 : vector<1x256xf32> to vector<16x256xf32>
    %268 = vector.broadcast %266 : vector<16x1xf32> to vector<16x256xf32>
    %269 = arith.subf %267, %268 : vector<16x256xf32>
    %270 = arith.minimumf %258, %269 : vector<16x256xf32>
    %271 = vector.extract_strided_slice %1 {offsets = [0, 22], sizes = [16, 1], strides = [1, 1]} : vector<16x36xf32> to vector<16x1xf32>
    %272 = vector.broadcast %265 : vector<1x256xf32> to vector<16x256xf32>
    %273 = vector.broadcast %271 : vector<16x1xf32> to vector<16x256xf32>
    %274 = arith.addf %272, %273 : vector<16x256xf32>
    %275 = arith.maximumf %263, %274 : vector<16x256xf32>
    %c0_50 = arith.constant 0 : index
    %c23 = arith.constant 23 : index
    %c0_51 = arith.constant 0 : index
    %276 = vector.load %arg2[%c0_50, %c23, %c0_51] : memref<1x36x256xf32, #tpu.memory_space<vmem>>, vector<1x1x256xf32>
    %277 = vector.shape_cast %276 : vector<1x1x256xf32> to vector<1x256xf32>
    %278 = vector.extract_strided_slice %0 {offsets = [0, 23], sizes = [16, 1], strides = [1, 1]} : vector<16x36xf32> to vector<16x1xf32>
    %279 = vector.broadcast %277 : vector<1x256xf32> to vector<16x256xf32>
    %280 = vector.broadcast %278 : vector<16x1xf32> to vector<16x256xf32>
    %281 = arith.subf %279, %280 : vector<16x256xf32>
    %282 = arith.minimumf %270, %281 : vector<16x256xf32>
    %283 = vector.extract_strided_slice %1 {offsets = [0, 23], sizes = [16, 1], strides = [1, 1]} : vector<16x36xf32> to vector<16x1xf32>
    %284 = vector.broadcast %277 : vector<1x256xf32> to vector<16x256xf32>
    %285 = vector.broadcast %283 : vector<16x1xf32> to vector<16x256xf32>
    %286 = arith.addf %284, %285 : vector<16x256xf32>
    %287 = arith.maximumf %275, %286 : vector<16x256xf32>
    %c0_52 = arith.constant 0 : index
    %c24 = arith.constant 24 : index
    %c0_53 = arith.constant 0 : index
    %288 = vector.load %arg2[%c0_52, %c24, %c0_53] : memref<1x36x256xf32, #tpu.memory_space<vmem>>, vector<1x1x256xf32>
    %289 = vector.shape_cast %288 : vector<1x1x256xf32> to vector<1x256xf32>
    %290 = vector.extract_strided_slice %0 {offsets = [0, 24], sizes = [16, 1], strides = [1, 1]} : vector<16x36xf32> to vector<16x1xf32>
    %291 = vector.broadcast %289 : vector<1x256xf32> to vector<16x256xf32>
    %292 = vector.broadcast %290 : vector<16x1xf32> to vector<16x256xf32>
    %293 = arith.subf %291, %292 : vector<16x256xf32>
    %294 = arith.minimumf %282, %293 : vector<16x256xf32>
    %295 = vector.extract_strided_slice %1 {offsets = [0, 24], sizes = [16, 1], strides = [1, 1]} : vector<16x36xf32> to vector<16x1xf32>
    %296 = vector.broadcast %289 : vector<1x256xf32> to vector<16x256xf32>
    %297 = vector.broadcast %295 : vector<16x1xf32> to vector<16x256xf32>
    %298 = arith.addf %296, %297 : vector<16x256xf32>
    %299 = arith.maximumf %287, %298 : vector<16x256xf32>
    %c0_54 = arith.constant 0 : index
    %c25 = arith.constant 25 : index
    %c0_55 = arith.constant 0 : index
    %300 = vector.load %arg2[%c0_54, %c25, %c0_55] : memref<1x36x256xf32, #tpu.memory_space<vmem>>, vector<1x1x256xf32>
    %301 = vector.shape_cast %300 : vector<1x1x256xf32> to vector<1x256xf32>
    %302 = vector.extract_strided_slice %0 {offsets = [0, 25], sizes = [16, 1], strides = [1, 1]} : vector<16x36xf32> to vector<16x1xf32>
    %303 = vector.broadcast %301 : vector<1x256xf32> to vector<16x256xf32>
    %304 = vector.broadcast %302 : vector<16x1xf32> to vector<16x256xf32>
    %305 = arith.subf %303, %304 : vector<16x256xf32>
    %306 = arith.minimumf %294, %305 : vector<16x256xf32>
    %307 = vector.extract_strided_slice %1 {offsets = [0, 25], sizes = [16, 1], strides = [1, 1]} : vector<16x36xf32> to vector<16x1xf32>
    %308 = vector.broadcast %301 : vector<1x256xf32> to vector<16x256xf32>
    %309 = vector.broadcast %307 : vector<16x1xf32> to vector<16x256xf32>
    %310 = arith.addf %308, %309 : vector<16x256xf32>
    %311 = arith.maximumf %299, %310 : vector<16x256xf32>
    %c0_56 = arith.constant 0 : index
    %c26 = arith.constant 26 : index
    %c0_57 = arith.constant 0 : index
    %312 = vector.load %arg2[%c0_56, %c26, %c0_57] : memref<1x36x256xf32, #tpu.memory_space<vmem>>, vector<1x1x256xf32>
    %313 = vector.shape_cast %312 : vector<1x1x256xf32> to vector<1x256xf32>
    %314 = vector.extract_strided_slice %0 {offsets = [0, 26], sizes = [16, 1], strides = [1, 1]} : vector<16x36xf32> to vector<16x1xf32>
    %315 = vector.broadcast %313 : vector<1x256xf32> to vector<16x256xf32>
    %316 = vector.broadcast %314 : vector<16x1xf32> to vector<16x256xf32>
    %317 = arith.subf %315, %316 : vector<16x256xf32>
    %318 = arith.minimumf %306, %317 : vector<16x256xf32>
    %319 = vector.extract_strided_slice %1 {offsets = [0, 26], sizes = [16, 1], strides = [1, 1]} : vector<16x36xf32> to vector<16x1xf32>
    %320 = vector.broadcast %313 : vector<1x256xf32> to vector<16x256xf32>
    %321 = vector.broadcast %319 : vector<16x1xf32> to vector<16x256xf32>
    %322 = arith.addf %320, %321 : vector<16x256xf32>
    %323 = arith.maximumf %311, %322 : vector<16x256xf32>
    %c0_58 = arith.constant 0 : index
    %c27 = arith.constant 27 : index
    %c0_59 = arith.constant 0 : index
    %324 = vector.load %arg2[%c0_58, %c27, %c0_59] : memref<1x36x256xf32, #tpu.memory_space<vmem>>, vector<1x1x256xf32>
    %325 = vector.shape_cast %324 : vector<1x1x256xf32> to vector<1x256xf32>
    %326 = vector.extract_strided_slice %0 {offsets = [0, 27], sizes = [16, 1], strides = [1, 1]} : vector<16x36xf32> to vector<16x1xf32>
    %327 = vector.broadcast %325 : vector<1x256xf32> to vector<16x256xf32>
    %328 = vector.broadcast %326 : vector<16x1xf32> to vector<16x256xf32>
    %329 = arith.subf %327, %328 : vector<16x256xf32>
    %330 = arith.minimumf %318, %329 : vector<16x256xf32>
    %331 = vector.extract_strided_slice %1 {offsets = [0, 27], sizes = [16, 1], strides = [1, 1]} : vector<16x36xf32> to vector<16x1xf32>
    %332 = vector.broadcast %325 : vector<1x256xf32> to vector<16x256xf32>
    %333 = vector.broadcast %331 : vector<16x1xf32> to vector<16x256xf32>
    %334 = arith.addf %332, %333 : vector<16x256xf32>
    %335 = arith.maximumf %323, %334 : vector<16x256xf32>
    %c0_60 = arith.constant 0 : index
    %c28 = arith.constant 28 : index
    %c0_61 = arith.constant 0 : index
    %336 = vector.load %arg2[%c0_60, %c28, %c0_61] : memref<1x36x256xf32, #tpu.memory_space<vmem>>, vector<1x1x256xf32>
    %337 = vector.shape_cast %336 : vector<1x1x256xf32> to vector<1x256xf32>
    %338 = vector.extract_strided_slice %0 {offsets = [0, 28], sizes = [16, 1], strides = [1, 1]} : vector<16x36xf32> to vector<16x1xf32>
    %339 = vector.broadcast %337 : vector<1x256xf32> to vector<16x256xf32>
    %340 = vector.broadcast %338 : vector<16x1xf32> to vector<16x256xf32>
    %341 = arith.subf %339, %340 : vector<16x256xf32>
    %342 = arith.minimumf %330, %341 : vector<16x256xf32>
    %343 = vector.extract_strided_slice %1 {offsets = [0, 28], sizes = [16, 1], strides = [1, 1]} : vector<16x36xf32> to vector<16x1xf32>
    %344 = vector.broadcast %337 : vector<1x256xf32> to vector<16x256xf32>
    %345 = vector.broadcast %343 : vector<16x1xf32> to vector<16x256xf32>
    %346 = arith.addf %344, %345 : vector<16x256xf32>
    %347 = arith.maximumf %335, %346 : vector<16x256xf32>
    %c0_62 = arith.constant 0 : index
    %c29 = arith.constant 29 : index
    %c0_63 = arith.constant 0 : index
    %348 = vector.load %arg2[%c0_62, %c29, %c0_63] : memref<1x36x256xf32, #tpu.memory_space<vmem>>, vector<1x1x256xf32>
    %349 = vector.shape_cast %348 : vector<1x1x256xf32> to vector<1x256xf32>
    %350 = vector.extract_strided_slice %0 {offsets = [0, 29], sizes = [16, 1], strides = [1, 1]} : vector<16x36xf32> to vector<16x1xf32>
    %351 = vector.broadcast %349 : vector<1x256xf32> to vector<16x256xf32>
    %352 = vector.broadcast %350 : vector<16x1xf32> to vector<16x256xf32>
    %353 = arith.subf %351, %352 : vector<16x256xf32>
    %354 = arith.minimumf %342, %353 : vector<16x256xf32>
    %355 = vector.extract_strided_slice %1 {offsets = [0, 29], sizes = [16, 1], strides = [1, 1]} : vector<16x36xf32> to vector<16x1xf32>
    %356 = vector.broadcast %349 : vector<1x256xf32> to vector<16x256xf32>
    %357 = vector.broadcast %355 : vector<16x1xf32> to vector<16x256xf32>
    %358 = arith.addf %356, %357 : vector<16x256xf32>
    %359 = arith.maximumf %347, %358 : vector<16x256xf32>
    %c0_64 = arith.constant 0 : index
    %c30 = arith.constant 30 : index
    %c0_65 = arith.constant 0 : index
    %360 = vector.load %arg2[%c0_64, %c30, %c0_65] : memref<1x36x256xf32, #tpu.memory_space<vmem>>, vector<1x1x256xf32>
    %361 = vector.shape_cast %360 : vector<1x1x256xf32> to vector<1x256xf32>
    %362 = vector.extract_strided_slice %0 {offsets = [0, 30], sizes = [16, 1], strides = [1, 1]} : vector<16x36xf32> to vector<16x1xf32>
    %363 = vector.broadcast %361 : vector<1x256xf32> to vector<16x256xf32>
    %364 = vector.broadcast %362 : vector<16x1xf32> to vector<16x256xf32>
    %365 = arith.subf %363, %364 : vector<16x256xf32>
    %366 = arith.minimumf %354, %365 : vector<16x256xf32>
    %367 = vector.extract_strided_slice %1 {offsets = [0, 30], sizes = [16, 1], strides = [1, 1]} : vector<16x36xf32> to vector<16x1xf32>
    %368 = vector.broadcast %361 : vector<1x256xf32> to vector<16x256xf32>
    %369 = vector.broadcast %367 : vector<16x1xf32> to vector<16x256xf32>
    %370 = arith.addf %368, %369 : vector<16x256xf32>
    %371 = arith.maximumf %359, %370 : vector<16x256xf32>
    %c0_66 = arith.constant 0 : index
    %c31 = arith.constant 31 : index
    %c0_67 = arith.constant 0 : index
    %372 = vector.load %arg2[%c0_66, %c31, %c0_67] : memref<1x36x256xf32, #tpu.memory_space<vmem>>, vector<1x1x256xf32>
    %373 = vector.shape_cast %372 : vector<1x1x256xf32> to vector<1x256xf32>
    %374 = vector.extract_strided_slice %0 {offsets = [0, 31], sizes = [16, 1], strides = [1, 1]} : vector<16x36xf32> to vector<16x1xf32>
    %375 = vector.broadcast %373 : vector<1x256xf32> to vector<16x256xf32>
    %376 = vector.broadcast %374 : vector<16x1xf32> to vector<16x256xf32>
    %377 = arith.subf %375, %376 : vector<16x256xf32>
    %378 = arith.minimumf %366, %377 : vector<16x256xf32>
    %379 = vector.extract_strided_slice %1 {offsets = [0, 31], sizes = [16, 1], strides = [1, 1]} : vector<16x36xf32> to vector<16x1xf32>
    %380 = vector.broadcast %373 : vector<1x256xf32> to vector<16x256xf32>
    %381 = vector.broadcast %379 : vector<16x1xf32> to vector<16x256xf32>
    %382 = arith.addf %380, %381 : vector<16x256xf32>
    %383 = arith.maximumf %371, %382 : vector<16x256xf32>
    %c0_68 = arith.constant 0 : index
    %c32 = arith.constant 32 : index
    %c0_69 = arith.constant 0 : index
    %384 = vector.load %arg2[%c0_68, %c32, %c0_69] : memref<1x36x256xf32, #tpu.memory_space<vmem>>, vector<1x1x256xf32>
    %385 = vector.shape_cast %384 : vector<1x1x256xf32> to vector<1x256xf32>
    %386 = vector.extract_strided_slice %0 {offsets = [0, 32], sizes = [16, 1], strides = [1, 1]} : vector<16x36xf32> to vector<16x1xf32>
    %387 = vector.broadcast %385 : vector<1x256xf32> to vector<16x256xf32>
    %388 = vector.broadcast %386 : vector<16x1xf32> to vector<16x256xf32>
    %389 = arith.subf %387, %388 : vector<16x256xf32>
    %390 = arith.minimumf %378, %389 : vector<16x256xf32>
    %391 = vector.extract_strided_slice %1 {offsets = [0, 32], sizes = [16, 1], strides = [1, 1]} : vector<16x36xf32> to vector<16x1xf32>
    %392 = vector.broadcast %385 : vector<1x256xf32> to vector<16x256xf32>
    %393 = vector.broadcast %391 : vector<16x1xf32> to vector<16x256xf32>
    %394 = arith.addf %392, %393 : vector<16x256xf32>
    %395 = arith.maximumf %383, %394 : vector<16x256xf32>
    %c0_70 = arith.constant 0 : index
    %c33 = arith.constant 33 : index
    %c0_71 = arith.constant 0 : index
    %396 = vector.load %arg2[%c0_70, %c33, %c0_71] : memref<1x36x256xf32, #tpu.memory_space<vmem>>, vector<1x1x256xf32>
    %397 = vector.shape_cast %396 : vector<1x1x256xf32> to vector<1x256xf32>
    %398 = vector.extract_strided_slice %0 {offsets = [0, 33], sizes = [16, 1], strides = [1, 1]} : vector<16x36xf32> to vector<16x1xf32>
    %399 = vector.broadcast %397 : vector<1x256xf32> to vector<16x256xf32>
    %400 = vector.broadcast %398 : vector<16x1xf32> to vector<16x256xf32>
    %401 = arith.subf %399, %400 : vector<16x256xf32>
    %402 = arith.minimumf %390, %401 : vector<16x256xf32>
    %403 = vector.extract_strided_slice %1 {offsets = [0, 33], sizes = [16, 1], strides = [1, 1]} : vector<16x36xf32> to vector<16x1xf32>
    %404 = vector.broadcast %397 : vector<1x256xf32> to vector<16x256xf32>
    %405 = vector.broadcast %403 : vector<16x1xf32> to vector<16x256xf32>
    %406 = arith.addf %404, %405 : vector<16x256xf32>
    %407 = arith.maximumf %395, %406 : vector<16x256xf32>
    %c0_72 = arith.constant 0 : index
    %c34 = arith.constant 34 : index
    %c0_73 = arith.constant 0 : index
    %408 = vector.load %arg2[%c0_72, %c34, %c0_73] : memref<1x36x256xf32, #tpu.memory_space<vmem>>, vector<1x1x256xf32>
    %409 = vector.shape_cast %408 : vector<1x1x256xf32> to vector<1x256xf32>
    %410 = vector.extract_strided_slice %0 {offsets = [0, 34], sizes = [16, 1], strides = [1, 1]} : vector<16x36xf32> to vector<16x1xf32>
    %411 = vector.broadcast %409 : vector<1x256xf32> to vector<16x256xf32>
    %412 = vector.broadcast %410 : vector<16x1xf32> to vector<16x256xf32>
    %413 = arith.subf %411, %412 : vector<16x256xf32>
    %414 = arith.minimumf %402, %413 : vector<16x256xf32>
    %415 = vector.extract_strided_slice %1 {offsets = [0, 34], sizes = [16, 1], strides = [1, 1]} : vector<16x36xf32> to vector<16x1xf32>
    %416 = vector.broadcast %409 : vector<1x256xf32> to vector<16x256xf32>
    %417 = vector.broadcast %415 : vector<16x1xf32> to vector<16x256xf32>
    %418 = arith.addf %416, %417 : vector<16x256xf32>
    %419 = arith.maximumf %407, %418 : vector<16x256xf32>
    %c0_74 = arith.constant 0 : index
    %c35 = arith.constant 35 : index
    %c0_75 = arith.constant 0 : index
    %420 = vector.load %arg2[%c0_74, %c35, %c0_75] : memref<1x36x256xf32, #tpu.memory_space<vmem>>, vector<1x1x256xf32>
    %421 = vector.shape_cast %420 : vector<1x1x256xf32> to vector<1x256xf32>
    %422 = vector.extract_strided_slice %0 {offsets = [0, 35], sizes = [16, 1], strides = [1, 1]} : vector<16x36xf32> to vector<16x1xf32>
    %423 = vector.broadcast %421 : vector<1x256xf32> to vector<16x256xf32>
    %424 = vector.broadcast %422 : vector<16x1xf32> to vector<16x256xf32>
    %425 = arith.subf %423, %424 : vector<16x256xf32>
    %426 = arith.minimumf %414, %425 : vector<16x256xf32>
    %427 = vector.extract_strided_slice %1 {offsets = [0, 35], sizes = [16, 1], strides = [1, 1]} : vector<16x36xf32> to vector<16x1xf32>
    %428 = vector.broadcast %421 : vector<1x256xf32> to vector<16x256xf32>
    %429 = vector.broadcast %427 : vector<16x1xf32> to vector<16x256xf32>
    %430 = arith.addf %428, %429 : vector<16x256xf32>
    %431 = arith.maximumf %419, %430 : vector<16x256xf32>
    %432 = tpu.concatenate %426, %431 in 0 : vector<16x256xf32>, vector<16x256xf32> -> vector<32x256xf32>
    %c0_76 = arith.constant 0 : index
    %c0_77 = arith.constant 0 : index
    %433 = vector.load %arg5[%c0_76, %c0_77] : memref<16x32xf32, #tpu.memory_space<vmem>>, vector<16x32xf32>
    %cst = arith.constant dense<0.000000e+00> : vector<16x256xf32>
    %434 = tpu.matmul %433, %432, %cst {dimension_numbers = #tpu.dot_dimension_numbers<[1], [0], [0], [1], [0, 0, 1, 1], [], []>} : vector<16x32xf32>, vector<32x256xf32>, vector<16x256xf32> -> vector<16x256xf32>
    %c0_78 = arith.constant 0 : index
    %c0_79 = arith.constant 0 : index
    %435 = vector.load %arg6[%c0_78, %c0_79] : memref<16x1xf32, #tpu.memory_space<vmem>>, vector<16x1xf32>
    %436 = vector.broadcast %435 : vector<16x1xf32> to vector<16x256xf32>
    %437 = arith.addf %434, %436 : vector<16x256xf32>
    %c0_80 = arith.constant 0 : index
    %c0_81 = arith.constant 0 : index
    %c0_82 = arith.constant 0 : index
    %438 = vector.load %arg7[%c0_80, %c0_81, %c0_82] : memref<1x16x256xf32, #tpu.memory_space<vmem>>, vector<1x16x256xf32>
    %439 = vector.shape_cast %438 : vector<1x16x256xf32> to vector<16x256xf32>
    %440 = vector.shape_cast %437 : vector<16x256xf32> to vector<1x16x256xf32>
    tpu.vector_store %arg7[%c0_80, %c0_81, %c0_82], %440 {strides = array<i32>} : memref<1x16x256xf32, #tpu.memory_space<vmem>>, vector<1x16x256xf32>,
    return
  }
  func.func @transform_0(%arg0: i32, %arg1: i32) -> (i32, i32, i32) {
    %c0_i32 = arith.constant 0 : i32
    %c0_i32_0 = arith.constant 0 : i32
    return %arg0, %c0_i32, %arg1 : i32, i32, i32
  }
  func.func @transform_1(%arg0: i32, %arg1: i32) -> (i32, i32) {
    %c0_i32 = arith.constant 0 : i32
    %c0_i32_0 = arith.constant 0 : i32
    %c0_i32_1 = arith.constant 0 : i32
    return %c0_i32, %c0_i32_0 : i32, i32
  }
  func.func @transform_2(%arg0: i32, %arg1: i32) -> (i32, i32) {
    %c0_i32 = arith.constant 0 : i32
    %c0_i32_0 = arith.constant 0 : i32
    %c0_i32_1 = arith.constant 0 : i32
    return %c0_i32, %c0_i32_0 : i32, i32
  }
  func.func @transform_3(%arg0: i32, %arg1: i32) -> (i32, i32) {
    %c0_i32 = arith.constant 0 : i32
    %c0_i32_0 = arith.constant 0 : i32
    %c0_i32_1 = arith.constant 0 : i32
    return %c0_i32, %c0_i32_0 : i32, i32
  }
  func.func @transform_4(%arg0: i32, %arg1: i32) -> (i32, i32) {
    %c0_i32 = arith.constant 0 : i32
    %c0_i32_0 = arith.constant 0 : i32
    %c0_i32_1 = arith.constant 0 : i32
    return %c0_i32, %c0_i32_0 : i32, i32
  }
  func.func @transform_5(%arg0: i32, %arg1: i32) -> (i32, i32, i32) {
    %c0_i32 = arith.constant 0 : i32
    %c0_i32_0 = arith.constant 0 : i32
    return %arg0, %c0_i32, %arg1 : i32, i32, i32
  }
}

</mosaic_0001>

<bundles_post_ra>
// kernel: tpu_custom_call.1
= control target key start
LH: loop header
LB: loop body
LE: loop exit
PB: predicated region body
PF: predicated region fallthrough
CT: control target
= control target key end

     0   :  { %10 = vsyncpa [#allocation3], 0  ;;  %s3623_s0 = inlined_call_operand.vmem [shape: f32[2,36,256], index: 0, kind: input, shape index: {}]   ;;  %s3624_s1 = inlined_call_operand.vmem [shape: f32[16,36], index: 1, kind: input, shape index: {}]   ;;  %s3625_s2 = inlined_call_operand.vmem [shape: f32[16,36], index: 2, kind: input, shape index: {}]   ;;  %s3626_s3 = inlined_call_operand.vmem [shape: f32[16,32], index: 3, kind: input, shape index: {}]   ;;  %s3627_s4 = inlined_call_operand.vmem [shape: f32[16,1], index: 4, kind: input, shape index: {}]   ;;  %s3628_s5 = inlined_call_operand.hbm [shape: f32[2,16,256], index: 5, kind: output, shape index: {}]  }
   0x1   :  { %12 = vsyncpa [#allocation3 + $0x1], 0  ;;  %s2470_s18 = smov 0   ;;  %s2472_s19 = smov 0  }
   0x2   :  { %s2474_s20 = smov 0   ;;  %s2476_s21 = smov 0  }
   0x3   :  { %s2478_s22 = smov 0   ;;  %s2480_s23 = smov 0  }
   0x4 LB: > { %s2070_s24 = sadd.s32 4294967295, %s2398_s23   ;;  %s2071_s25 = sadd.s32 4294967294, %s2398_s23   ;;  %s2398_s23 = sphi %s2480_s23, %s18_s23   ;;  %s2394_s22 = sphi %s2478_s22, %s3714_s22   ;;  %s2390_s21 = sphi %s2476_s21, %s3713_s21   ;;  %s2386_s20 = sphi %s2474_s20, %s3712_s20   ;;  %s2382_s19 = sphi %s2472_s19, %s3711_s19   ;;  %s2378_s18 = sphi %s2470_s18, %s3710_s18  }
   0x5   : > { %s30_s26 = sadd.s32 1, %s2394_s22  ;;  %s151_s27 = sadd.s32 1, %s2386_s20 }
   0x6   : > { %p32_p0 = scmp.ge.s32.totalorder %s30_s26, 2  ;;  %p161_p1 = scmp.ne.s32.totalorder %s2386_s20, %s2382_s19 }
   0x7   : > { %p162_p2 = scmp.eq.s32.totalorder %s2070_s24, 1  ;;  %p167_p3 = scmp.ne.s32.totalorder %s2382_s19, %s2378_s18 }
   0x8   : > { %s3716_s26 = smov (%p32_p0, %s30_s26), 0  ;;  %p168_p5 = scmp.eq.s32.totalorder %s2071_s25, 1 }
   0x9   : > { %p2510_p4 = por %p162_p2, %p161_p1  ;;  %s146_s29 = ssub.s32 %s2394_s22, %s3716_s26 }
   0xa   : > { %p2074_p6 = scmp.ge.s32.totalorder %s2398_s23, 1  ;;  %p149_p7 = scmp.eq.s32.totalorder %s146_s29, 0 }
   0xb   : > { %p2517_p8 = por %p168_p5, %p167_p3  ;;  %p211_p9 = scmp.lt.s32.totalorder %s2398_s23, 3 }
   0xc   : > { %s2523_s6 = scalar_select %p149_p7, %s2386_s20, %s151_s27  }
   0xd   : > { %p212_p10 = pnand %p2074_p6, %p211_p9 }
   0xf   : > { %215 = sbr.rel (%p212_p10) target bundleno = 816 (0x330), region = 40 }
  0x16   : > { %v2528_v0 = vld [vmem:[%s3625_s2] sm:$0xff]  ;;  %v3641_v2 = vmov 0   ;;  %v2542_v3 = vld [vmem:[%s3625_s2 + $0x8] sm:$0xff]  ;;  %v2401_v5 = vmov 1   ;;  %v2402_v6 = vmov 2   ;;  %v2403_v7 = vmov 3  }
  0x17   : > { %v2533_v1 = vld [vmem:[%s3624_s1] sm:$0xff]  ;;  %2228 = vset.pattern.permute.xlu1 %v3641_v2  ;;  %2227 = vset.pattern.permute.xlu0 %v3641_v2  ;;  %v2547_v4 = vld [vmem:[%s3624_s1 + $0x8] sm:$0xff]  ;;  %v2404_v8 = vmov 4   ;;  %v2405_v9 = vmov 5   ;;  %v2406_v10 = vmov 6   ;;  %v2407_v11 = vmov 7  }
  0x18   : > { %286 = vperm.xlu1 %2228, %v2528_v0   ;;  %272 = vperm.xlu0 %2227, %v2533_v1   ;;  %v2408_v12 = vmov 8   ;;  %v2409_v13 = vmov 9   ;;  %v2410_v14 = vmov 10   ;;  %v2411_v15 = vmov 11   ;;  %p244_p11 = scmp.lt.s32.totalorder %s2390_s21, 1  ;;  %s240_s29 = sand.u32 1, %s2382_s19  }
  0x19   : > { %v2412_v16 = vmov 12   ;;  %v2413_v17 = vmov 13   ;;  %v2414_v18 = vmov 14   ;;  %v2415_v19 = vmov 15   ;;  %s2075_s7 = sshll.u32 %s240_s29, 5  ;;  %s2119_s10 = sshll.u32 %s2390_s21, 9 }
  0x1a   : > { %v2416_v20 = vmov 16   ;;  %v2417_v21 = vmov 17   ;;  %v2418_v24 = vmov 19   ;;  %s245_s15 = scalar_select %p244_p11, %s2390_s21, 1  ;;  %v260_v29 = vlaneseq }
  0x1b   : > { %v2419_v30 = vmov 20   ;;  %v3645_v42 = vmov 22   ;;  %vm1887_vm0 = vcmask 261120   ;;  %s242_s8 = scalar_lea.vmem [#allocation2], %s2075_s7  ;;  %s3575_s13 = scalar_lea.hbm %s3628_s5, %s2119_s10 }
  0x1c   : > { %291 = vperm.xlu1 %2228, %v2542_v3   ;;  %277 = vperm.xlu0 %2227, %v2547_v4   ;;  %s2132_s16 = smul.u32 80, %s245_s15  ;;  %v261_v33 = vshrl.u32 %v260_v29, 7  ;;  %s1991_s9 = sshll.u32 %s242_s8, 4  ;;  %s3570_s9 = int_to_ptr.vmem [resolvable:$true] %s1991_s9 }
  0x1d   : > { %s3577_s21 = scalar_lea.sflag [#allocation3], %s240_s29  ;;  %s2320_s14 = scalar_lea.vmem %s3570_s9, 512 }
  0x1e   : > { %s2634_s25 = scalar_lea.vmem %s3623_s0, %s2132_s16  ;;  %v2637_v34 = vsub.s32 0, %v261_v33  ;;  %v2639_v35 = vsub.s32 1, %v261_v33  ;;  %p2321_p12 = scmp.ne.s32.totalorder %s3570_s9, %s2320_s14 }
  0x1f   : > { %v2077_v36 = vld [vmem:[%s2634_s25 + $0x1] ss:$8 sm:$0x3]  ;;  %v258_v39 = vld [vmem:[%s2634_s25] ss:$8 sm:$0x3] }
  0x20   : > { %2230 = vset.pattern.permute.xlu1 %v2401_v5  ;;  %2229 = vset.pattern.permute.xlu0 %v2401_v5  ;;  %v2078_v40 = vld [vmem:[%s2634_s25 + $0x2] ss:$8 sm:$0x3]  ;;  %v2079_v41 = vld [vmem:[%s2634_s25 + $0x3] ss:$8 sm:$0x3]  ;;  %v2650_v43 = vrot.slane %v2077_v36, %v2637_v34  ;;  %v2653_v44 = vrot.slane %v2077_v36, %v2639_v35  ;;  %v2658_v46 = vrot.slane %v258_v39, %v2637_v34  ;;  %p2322_p13 = pnand %p2321_p12, %p2510_p4 }
  0x21   : > { %316 = vperm.xlu1 %2230, %v2547_v4   ;;  %312 = vperm.xlu0 %2229, %v2533_v1   ;;  %v2080_v45 = vld [vmem:[%s2634_s25 + $0x4] ss:$8 sm:$0x3]  ;;  %v2661_v47 = vrot.slane %v258_v39, %v2639_v35  ;;  %v2664_v48 = vrot.slane %v2078_v40, %v2637_v34  ;;  %v2672_v52 = vrot.slane %v2078_v40, %v2639_v35  ;;  %s2437_s15 = smov [#allocation2]  }
  0x22   : > { %v2678_v54 = vrot.slane %v2079_v41, %v2637_v34  ;;  %v2681_v55 = vrot.slane %v2079_v41, %v2639_v35  ;;  %v2684_v56 = vrot.slane %v2080_v45, %v2637_v34  ;;  %v2687_v57 = vrot.slane %v2080_v45, %v2639_v35  ;;  %p2323_p0 = pneg %p2322_p13  ;;  %s2324_s16 = sshll.u32 %s2437_s15, 4  ;;  %s2325_s16 = int_to_ptr.vmem [resolvable:$false] %s2324_s16 }
  0x23   : > { %s2326_s17 = scalar_lea.vmem %s2325_s16, 1024  ;;  %p2327_p1 = scmp.lt.s32.totalorder %s3570_s9, %s2325_s16 }
  0x24   : > { %p2328_p2 = scmp.lt.s32.totalorder %s2326_s17, %s2320_s14 }
  0x25   : > { %328 = vperm.xlu1 %2230, %v2528_v0   ;;  %332 = vperm.xlu0 %2229, %v2542_v3  }
  0x26   : > { %p2329_p3 = por %p2328_p2, %p2327_p1 }
  0x28   : > { %p2330_p5 = pnand %p2329_p3, %p2323_p0 }
  0x29   : > { %2231 = vset.pattern.permute.xlu1 %v2402_v6  ;;  %2232 = vset.pattern.permute.xlu0 %v2402_v6 }
  0x2a   : > { %357 = vperm.xlu1 %2231, %v2533_v1   ;;  %361 = vperm.xlu0 %2232, %v2547_v4  }
  0x2e   : > { %373 = vperm.xlu1 %2231, %v2528_v0   ;;  %2233 = vset.pattern.permute.xlu0 %v2403_v7 }
  0x2f   : > { %402 = vperm.xlu0 %2233, %v2533_v1  }
  0x32   : > { %377 = vperm.xlu1 %2231, %v2542_v3  }
  0x33   : > { %422 = vperm.xlu0 %2233, %v2542_v3  }
  0x36   : > { %2234 = vset.pattern.permute.xlu1 %v2403_v7 }
  0x37   : > { %406 = vperm.xlu1 %2234, %v2547_v4   ;;  %2236 = vset.pattern.permute.xlu0 %v2404_v8 }
  0x38   : > { %451 = vperm.xlu0 %2236, %v2547_v4  }
  0x3b   : > { %418 = vperm.xlu1 %2234, %v2528_v0  }
  0x3c   : > { %2237 = vset.pattern.permute.xlu0 %v2405_v9 }
  0x3d   : > { %492 = vperm.xlu0 %2237, %v2533_v1  }
  0x3f   : > { %2235 = vset.pattern.permute.xlu1 %v2404_v8 }
  0x40   : > { %447 = vperm.xlu1 %2235, %v2533_v1  }
  0x41   : > { %512 = vperm.xlu0 %2237, %v2542_v3  }
  0x44   : > { %463 = vperm.xlu1 %2235, %v2528_v0  }
  0x45   : > { %2240 = vset.pattern.permute.xlu0 %v2406_v10 }
  0x46   : > { %541 = vperm.xlu0 %2240, %v2547_v4  }
  0x48   : > { %467 = vperm.xlu1 %2235, %v2542_v3  }
  0x4a   : > { %2241 = vset.pattern.permute.xlu0 %v2407_v11 }
  0x4b   : > { %582 = vperm.xlu0 %2241, %v2533_v1  }
  0x4c   : > { %2238 = vset.pattern.permute.xlu1 %v2405_v9 }
  0x4d   : > { %496 = vperm.xlu1 %2238, %v2547_v4  }
  0x4f   : > { %602 = vperm.xlu0 %2241, %v2542_v3  }
  0x51   : > { %508 = vperm.xlu1 %2238, %v2528_v0  }
  0x53   : > { %2244 = vset.pattern.permute.xlu0 %v2408_v12 }
  0x54   : > { %631 = vperm.xlu0 %2244, %v2547_v4  }
  0x55   : > { %2239 = vset.pattern.permute.xlu1 %v2406_v10 }
  0x56   : > { %537 = vperm.xlu1 %2239, %v2533_v1  }
  0x58   : > { %2245 = vset.pattern.permute.xlu0 %v2409_v13 }
  0x59   : > { %672 = vperm.xlu0 %2245, %v2533_v1  }
  0x5a   : > { %553 = vperm.xlu1 %2239, %v2528_v0  }
  0x5d   : > { %692 = vperm.xlu0 %2245, %v2542_v3  }
  0x5e   : > { %557 = vperm.xlu1 %2239, %v2542_v3  }
  0x61   : > { %2248 = vset.pattern.permute.xlu0 %v2410_v14 }
  0x62   : > { %2242 = vset.pattern.permute.xlu1 %v2407_v11  ;;  %721 = vperm.xlu0 %2248, %v2547_v4  }
  0x63   : > { %586 = vperm.xlu1 %2242, %v2547_v4  }
  0x66   : > { %2249 = vset.pattern.permute.xlu0 %v2411_v15 }
  0x67   : > { %598 = vperm.xlu1 %2242, %v2528_v0   ;;  %762 = vperm.xlu0 %2249, %v2533_v1  }
  0x6b   : > { %2243 = vset.pattern.permute.xlu1 %v2408_v12  ;;  %782 = vperm.xlu0 %2249, %v2542_v3  }
  0x6c   : > { %627 = vperm.xlu1 %2243, %v2533_v1  }
  0x6f   : > { %2252 = vset.pattern.permute.xlu0 %v2412_v16 }
  0x70   : > { %643 = vperm.xlu1 %2243, %v2528_v0   ;;  %811 = vperm.xlu0 %2252, %v2547_v4  }
  0x74   : > { %647 = vperm.xlu1 %2243, %v2542_v3   ;;  %2253 = vset.pattern.permute.xlu0 %v2413_v17 }
  0x75   : > { %852 = vperm.xlu0 %2253, %v2533_v1  }
  0x78   : > { %2246 = vset.pattern.permute.xlu1 %v2409_v13 }
  0x79   : > { %676 = vperm.xlu1 %2246, %v2547_v4   ;;  %872 = vperm.xlu0 %2253, %v2542_v3  }
  0x7d   : > { %688 = vperm.xlu1 %2246, %v2528_v0   ;;  %2256 = vset.pattern.permute.xlu0 %v2414_v18 }
  0x7e   : > { %901 = vperm.xlu0 %2256, %v2547_v4  }
  0x81   : > { %2247 = vset.pattern.permute.xlu1 %v2410_v14 }
  0x82   : > { %717 = vperm.xlu1 %2247, %v2533_v1   ;;  %2257 = vset.pattern.permute.xlu0 %v2415_v19 }
  0x83   : > { %942 = vperm.xlu0 %2257, %v2533_v1  }
  0x86   : > { %733 = vperm.xlu1 %2247, %v2528_v0  }
  0x87   : > { %2259 = vset.pattern.permute.xlu0 %v2416_v20 }
  0x88   : > { %987 = vperm.xlu0 %2259, %v2533_v1  }
  0x8a   : > { %737 = vperm.xlu1 %2247, %v2542_v3  }
  0x8c   : > { %1007 = vperm.xlu0 %2259, %v2542_v3  }
  0x8e   : > { %2250 = vset.pattern.permute.xlu1 %v2411_v15 }
  0x8f   : > { %766 = vperm.xlu1 %2250, %v2547_v4  }
  0x90   : > { %2264 = vset.pattern.permute.xlu0 %v2417_v21 }
  0x91   : > { %1032 = vperm.xlu0 %2264, %v2533_v1  }
  0x93   : > { %778 = vperm.xlu1 %2250, %v2528_v0  }
  0x95   : > { %1048 = vperm.xlu0 %2264, %v2528_v0  }
  0x97   : > { %v2608_v22 = vpop.permute.xlu1 %286  ;;  %2251 = vset.pattern.permute.xlu1 %v2412_v16  ;;  %v2610_v23 = vpop.permute.xlu0 %272 }
  0x98   : > { %807 = vperm.xlu1 %2251, %v2533_v1   ;;  %v280_v58 = vsub.f32 %v2658_v46, %v2610_v23  ;;  %v281_v59 = vsub.f32 %v2661_v47, %v2610_v23 }
  0x99   : > { %2268 = vset.pattern.permute.xlu0 %v2418_v24 }
  0x9a   : > { %1126 = vperm.xlu0 %2268, %v2547_v4  }
  0x9b   : > { %v292_v25 = vpop.permute.xlu1 %291  ;;  %v2616_v26 = vpop.permute.xlu0 %277 }
  0x9c   : > { %823 = vperm.xlu1 %2251, %v2528_v0   ;;  %v296_v60 = vadd.f32 %v292_v25, %v2658_v46  ;;  %v297_v61 = vadd.f32 %v292_v25, %v2661_v47  ;;  %v282_v62 = vsub.f32 %v2658_v46, %v2616_v26  ;;  %v283_v63 = vsub.f32 %v2661_v47, %v2616_v26 }
  0x9d   : > { %v3643_v26 = vmov 23  }
  0x9e   : > { %1142 = vperm.xlu0 %2268, %v2542_v3  }
  0xa0   : > { %v2621_v27 = vpop.permute.xlu1 %316  ;;  %827 = vperm.xlu1 %2251, %v2542_v3   ;;  %v2624_v28 = vpop.permute.xlu0 %312 }
  0xa1   : > { %v321_v5 = vsub.f32 %v2650_v43, %v2621_v27  ;;  %v322_v6 = vsub.f32 %v2653_v44, %v2621_v27 }
  0xa2   : > { %2272 = vset.pattern.permute.xlu0 %v2419_v30 }
  0xa3   : > { %1167 = vperm.xlu0 %2272, %v2533_v1   ;;  %v325_v27 = vmin.f32 %v282_v62, %v321_v5  ;;  %v326_v29 = vmin.f32 %v283_v63, %v322_v6  ;;  %v2081_v6 = vld [vmem:[%s2634_s25 + $0x5] ss:$8 sm:$0x3] }
  0xa4   : > { %v2628_v31 = vpop.permute.xlu1 %328  ;;  %2254 = vset.pattern.permute.xlu1 %v2413_v17  ;;  %v333_v32 = vpop.permute.xlu0 %332  ;;  %v319_v17 = vsub.f32 %v2650_v43, %v2624_v28 }
  0xa5   : > { %856 = vperm.xlu1 %2254, %v2547_v4   ;;  %v337_v50 = vadd.f32 %v333_v32, %v2650_v43  ;;  %v338_v51 = vadd.f32 %v333_v32, %v2653_v44 }
  0xa6   : > { %v323_v45 = vmin.f32 %v280_v58, %v319_v17 }
  0xa7   : > { %1183 = vperm.xlu0 %2272, %v2528_v0   ;;  %v341_v8 = vmax.f32 %v296_v60, %v337_v50  ;;  %v342_v9 = vmax.f32 %v297_v61, %v338_v51 }
  0xa9   : > { %868 = vperm.xlu1 %2254, %v2528_v0   ;;  %v2643_v37 = vpop.permute.xlu1 %357  ;;  %v362_v38 = vpop.permute.xlu0 %361 }
  0xaa   : > { %v366_v13 = vsub.f32 %v2664_v48, %v362_v38  ;;  %v367_v14 = vsub.f32 %v2672_v52, %v362_v38  ;;  %v364_v61 = vsub.f32 %v2664_v48, %v2643_v37  ;;  %v365_v62 = vsub.f32 %v2672_v52, %v2643_v37 }
  0xab   : > { %2276 = vset.pattern.permute.xlu0 %v3645_v42  ;;  %v2749_v37 = vrot.slane %v2081_v6, %v2637_v34 }
  0xac   : > { %1261 = vperm.xlu0 %2276, %v2547_v4   ;;  %v370_v36 = vmin.f32 %v325_v27, %v366_v13  ;;  %v371_v38 = vmin.f32 %v326_v29, %v367_v14  ;;  %v3639_v14 = vmov 25  }
  0xad   : > { %2255 = vset.pattern.permute.xlu1 %v2414_v18  ;;  %v2667_v49 = vpop.permute.xlu1 %373  ;;  %v320_v18 = vsub.f32 %v2653_v44, %v2624_v28 }
  0xae   : > { %897 = vperm.xlu1 %2255, %v2533_v1   ;;  %v2675_v53 = vpop.permute.xlu0 %402 }
  0xaf   : > { %v324_v50 = vmin.f32 %v281_v59, %v320_v18  ;;  %v409_v58 = vsub.f32 %v2678_v54, %v2675_v53  ;;  %v410_v59 = vsub.f32 %v2681_v55, %v2675_v53 }
  0xb0   : > { %1277 = vperm.xlu0 %2276, %v2542_v3  }
  0xb1   : > { %v378_v7 = vpop.permute.xlu1 %377 }
  0xb2   : > { %v382_v10 = vadd.f32 %v378_v7, %v2664_v48  ;;  %v383_v11 = vadd.f32 %v378_v7, %v2672_v52  ;;  %913 = vperm.xlu1 %2255, %v2528_v0   ;;  %v423_v12 = vpop.permute.xlu0 %422 }
  0xb3   : > { %v2710_v15 = vadd.f32 %v423_v12, %v2678_v54  ;;  %v2713_v16 = vadd.f32 %v423_v12, %v2681_v55  ;;  %v369_v12 = vmin.f32 %v324_v50, %v365_v62 }
  0xb4   : > { %v2719_v23 = vmax.f32 %v341_v8, %v382_v10  ;;  %v2721_v25 = vmax.f32 %v342_v9, %v383_v11  ;;  %2280 = vset.pattern.permute.xlu0 %v3643_v26  ;;  %v2752_v10 = vrot.slane %v2081_v6, %v2639_v35  ;;  %v368_v11 = vmin.f32 %v323_v45, %v364_v61 }
  0xb5   : > { %1302 = vperm.xlu0 %2280, %v2533_v1   ;;  %v414_v53 = vmin.f32 %v369_v12, %v410_v59 }
  0xb6   : > { %v431_v32 = vmax.f32 %v2719_v23, %v2710_v15  ;;  %v432_v33 = vmax.f32 %v2721_v25, %v2713_v16  ;;  %917 = vperm.xlu1 %2255, %v2542_v3   ;;  %v407_v28 = vpop.permute.xlu1 %406  ;;  %v413_v17 = vmin.f32 %v368_v11, %v409_v58 }
  0xb7   : > { %v411_v39 = vsub.f32 %v2678_v54, %v407_v28  ;;  %v412_v40 = vsub.f32 %v2681_v55, %v407_v28  ;;  %v452_v41 = vpop.permute.xlu0 %451 }
  0xb8   : > { %v456_v51 = vsub.f32 %v2684_v56, %v452_v41  ;;  %v457_v60 = vsub.f32 %v2687_v57, %v452_v41 }
  0xb9   : > { %v415_v63 = vmin.f32 %v370_v36, %v411_v39  ;;  %v416_v5 = vmin.f32 %v371_v38, %v412_v40  ;;  %1318 = vperm.xlu0 %2280, %v2528_v0  }
  0xba   : > { %2258 = vset.pattern.permute.xlu1 %v2415_v19  ;;  %v2741_v7 = vpop.permute.xlu1 %418 }
  0xbb   : > { %v460_v8 = vmin.f32 %v415_v63, %v456_v51  ;;  %v461_v9 = vmin.f32 %v416_v5, %v457_v60  ;;  %946 = vperm.xlu1 %2258, %v2547_v4   ;;  %v2082_v51 = vld [vmem:[%s2634_s25 + $0x6] ss:$8 sm:$0x3]  ;;  %v3637_v60 = vmov 26  }
  0xbc   : > { %v493_v13 = vpop.permute.xlu0 %492  ;;  %v2776_v58 = vrot.slane %v2082_v51, %v2637_v34  ;;  %v2779_v59 = vrot.slane %v2082_v51, %v2639_v35 }
  0xbd   : > { %2284 = vset.pattern.permute.xlu0 %v3639_v14  ;;  %v499_v28 = vsub.f32 %v2749_v37, %v493_v13  ;;  %v500_v36 = vsub.f32 %v2752_v10, %v493_v13 }
  0xbe   : > { %1396 = vperm.xlu0 %2284, %v2547_v4  }
  0xbf   : > { %958 = vperm.xlu1 %2258, %v2528_v0   ;;  %v448_v18 = vpop.permute.xlu1 %447 }
  0xc0   : > { %v454_v27 = vsub.f32 %v2684_v56, %v448_v18  ;;  %v455_v29 = vsub.f32 %v2687_v57, %v448_v18  ;;  %v513_v50 = vpop.permute.xlu0 %512 }
  0xc1   : > { %v517_v5 = vadd.f32 %v513_v50, %v2749_v37  ;;  %v518_v6 = vadd.f32 %v513_v50, %v2752_v10 }
  0xc2   : > { %v458_v38 = vmin.f32 %v413_v17, %v454_v27  ;;  %v459_v39 = vmin.f32 %v414_v53, %v455_v29  ;;  %1412 = vperm.xlu0 %2284, %v2542_v3  }
  0xc3   : > { %2260 = vset.pattern.permute.xlu1 %v2416_v20  ;;  %v2763_v40 = vpop.permute.xlu1 %463 }
  0xc4   : > { %v503_v41 = vmin.f32 %v458_v38, %v499_v28  ;;  %v504_v45 = vmin.f32 %v459_v39, %v500_v36  ;;  %991 = vperm.xlu1 %2260, %v2547_v4  }
  0xc5   : > { %v542_v12 = vpop.permute.xlu0 %541 }
  0xc6   : > { %2288 = vset.pattern.permute.xlu0 %v3637_v60  ;;  %v546_v15 = vsub.f32 %v2776_v58, %v542_v12  ;;  %v547_v23 = vsub.f32 %v2779_v59, %v542_v12 }
  0xc7   : > { %v468_v61 = vpop.permute.xlu1 %467  ;;  %1437 = vperm.xlu0 %2288, %v2533_v1  }
  0xc8   : > { %v472_v62 = vadd.f32 %v468_v61, %v2684_v56  ;;  %v473_v63 = vadd.f32 %v468_v61, %v2687_v57  ;;  %2261 = vset.pattern.permute.xlu1 %v2415_v19 }
  0xc9   : > { %962 = vperm.xlu1 %2261, %v2542_v3  }
  0xca   : > { %v476_v11 = vmax.f32 %v431_v32, %v472_v62  ;;  %v477_v19 = vmax.f32 %v432_v33, %v473_v63  ;;  %v2083_v32 = vld [vmem:[%s2634_s25 + $0x7] ss:$8 sm:$0x3]  ;;  %v3633_v33 = vmov 28   ;;  %v2425_v62 = vmov 18  }
  0xcb   : > { %1453 = vperm.xlu0 %2288, %v2528_v0   ;;  %v2801_v38 = vrot.slane %v2083_v32, %v2637_v34  ;;  %v2804_v39 = vrot.slane %v2083_v32, %v2639_v35 }
  0xcc   : > { %v521_v13 = vmax.f32 %v476_v11, %v517_v5  ;;  %v522_v17 = vmax.f32 %v477_v19, %v518_v6  ;;  %v497_v53 = vpop.permute.xlu1 %496  ;;  %v3629_v11 = vmov 29  }
  0xcd   : > { %v501_v18 = vsub.f32 %v2749_v37, %v497_v53  ;;  %v502_v27 = vsub.f32 %v2752_v10, %v497_v53  ;;  %2262 = vset.pattern.permute.xlu1 %v2417_v21 }
  0xce   : > { %1036 = vperm.xlu1 %2262, %v2547_v4  }
  0xcf   : > { %v505_v16 = vmin.f32 %v460_v8, %v501_v18  ;;  %v506_v25 = vmin.f32 %v461_v9, %v502_v27  ;;  %2292 = vset.pattern.permute.xlu0 %v3633_v33  ;;  %v583_v8 = vpop.permute.xlu0 %582  ;;  %v2084_v18 = vld [vmem:[%s2634_s25 + $0x10] ss:$8 sm:$0x3]  ;;  %v3635_v33 = vmov 32  }
  0xd0   : > { %v2796_v29 = vpop.permute.xlu1 %508  ;;  %1531 = vperm.xlu0 %2292, %v2547_v4   ;;  %v589_v61 = vsub.f32 %v2801_v38, %v583_v8 }
  0xd1   : > { %v550_v28 = vmin.f32 %v505_v16, %v546_v15  ;;  %v551_v36 = vmin.f32 %v506_v25, %v547_v23  ;;  %v2825_v16 = vrot.slane %v2084_v18, %v2637_v34  ;;  %v2828_v25 = vrot.slane %v2084_v18, %v2639_v35 }
  0xd2   : > { %2263 = vset.pattern.permute.xlu1 %v2416_v20  ;;  %v590_v20 = vsub.f32 %v2804_v39, %v583_v8 }
  0xd3   : > { %1003 = vperm.xlu1 %2263, %v2528_v0   ;;  %v603_v53 = vpop.permute.xlu0 %602 }
  0xd4   : > { %1547 = vperm.xlu0 %2292, %v2542_v3   ;;  %v608_v23 = vadd.f32 %v603_v53, %v2804_v39 }
  0xd5   : > { %v538_v9 = vpop.permute.xlu1 %537 }
  0xd6   : > { %v544_v50 = vsub.f32 %v2776_v58, %v538_v9  ;;  %v545_v51 = vsub.f32 %v2779_v59, %v538_v9 }
  0xd7   : > { %2265 = vset.pattern.permute.xlu1 %v2425_v62  ;;  %v632_v9 = vpop.permute.xlu0 %631 }
  0xd8   : > { %v548_v63 = vmin.f32 %v503_v41, %v544_v50  ;;  %v549_v5 = vmin.f32 %v504_v45, %v545_v51  ;;  %1077 = vperm.xlu1 %2265, %v2533_v1   ;;  %2296 = vset.pattern.permute.xlu0 %v3629_v11  ;;  %v607_v45 = vadd.f32 %v603_v53, %v2801_v38 }
  0xd9   : > { %v2813_v6 = vpop.permute.xlu1 %553  ;;  %1572 = vperm.xlu0 %2296, %v2533_v1   ;;  %v637_v53 = vsub.f32 %v2828_v25, %v632_v9 }
  0xda   : > { %v593_v19 = vmin.f32 %v548_v63, %v589_v61  ;;  %v594_v12 = vmin.f32 %v549_v5, %v590_v20  ;;  %v636_v5 = vsub.f32 %v2825_v16, %v632_v9 }
  0xdc   : > { %1081 = vperm.xlu1 %2265, %v2547_v4  }
  0xdd   : > { %v558_v27 = vpop.permute.xlu1 %557  ;;  %1588 = vperm.xlu0 %2296, %v2528_v0  }
  0xde   : > { %v562_v15 = vadd.f32 %v558_v27, %v2776_v58  ;;  %v563_v41 = vadd.f32 %v558_v27, %v2779_v59 }
  0xe0   : > { %v566_v32 = vmax.f32 %v521_v13, %v562_v15  ;;  %v567_v8 = vmax.f32 %v522_v17, %v563_v41  ;;  %2266 = vset.pattern.permute.xlu1 %v2417_v21  ;;  %v2085_v13 = vld [vmem:[%s2634_s25 + $0x11] ss:$8 sm:$0x3] }
  0xe1   : > { %1052 = vperm.xlu1 %2266, %v2542_v3   ;;  %v2842_v41 = vrot.slane %v2085_v13, %v2637_v34 }
  0xe2   : > { %v611_v50 = vmax.f32 %v566_v32, %v607_v45  ;;  %v612_v51 = vmax.f32 %v567_v8, %v608_v23  ;;  %v587_v61 = vpop.permute.xlu1 %586  ;;  %v2845_v45 = vrot.slane %v2085_v13, %v2639_v35  ;;  %v673_v23 = vpop.permute.xlu0 %672 }
  0xe3   : > { %v591_v20 = vsub.f32 %v2801_v38, %v587_v61  ;;  %v592_v63 = vsub.f32 %v2804_v39, %v587_v61  ;;  %v679_v8 = vsub.f32 %v2842_v41, %v673_v23 }
  0xe4   : > { %v680_v9 = vsub.f32 %v2845_v45, %v673_v23 }
  0xe5   : > { %v595_v18 = vmin.f32 %v550_v28, %v591_v20  ;;  %v596_v27 = vmin.f32 %v551_v36, %v592_v63  ;;  %2267 = vset.pattern.permute.xlu1 %v2418_v24 }
  0xe6   : > { %1122 = vperm.xlu1 %2267, %v2533_v1   ;;  %v2839_v21 = vpop.permute.xlu1 %598 }
  0xe7   : > { %v640_v17 = vmin.f32 %v595_v18, %v636_v5  ;;  %v641_v15 = vmin.f32 %v596_v27, %v637_v53  ;;  %v2086_v18 = vld [vmem:[%s2634_s25 + $0x12] ss:$8 sm:$0x3] }
  0xea   : > { %2269 = vset.pattern.permute.xlu1 %v2425_v62  ;;  %v693_v62 = vpop.permute.xlu0 %692 }
  0xeb   : > { %1093 = vperm.xlu1 %2269, %v2528_v0   ;;  %v628_v28 = vpop.permute.xlu1 %627  ;;  %v2858_v13 = vadd.f32 %v693_v62, %v2842_v41 }
  0xec   : > { %v634_v36 = vsub.f32 %v2825_v16, %v628_v28  ;;  %v635_v32 = vsub.f32 %v2828_v25, %v628_v28 }
  0xee   : > { %v638_v61 = vmin.f32 %v593_v19, %v634_v36  ;;  %v639_v20 = vmin.f32 %v594_v12, %v635_v32  ;;  %v698_v19 = vadd.f32 %v693_v62, %v2845_v45  ;;  %v2865_v12 = vrot.slane %v2086_v18, %v2637_v34 }
  0xef   : > { %1097 = vperm.xlu1 %2269, %v2542_v3   ;;  %v2853_v63 = vpop.permute.xlu1 %643  ;;  %v2868_v36 = vrot.slane %v2086_v18, %v2639_v35  ;;  %v3631_v32 = vmov 31  }
  0xf0   : > { %v683_v5 = vmin.f32 %v638_v61, %v679_v8  ;;  %v684_v53 = vmin.f32 %v639_v20, %v680_v9  ;;  %3664 = vst [vmem:[#allocation5_spill] sm:$0xff] %v2865_v12  ;;  %2300 = vset.pattern.permute.xlu0 %v3631_v32  ;;  %v722_v61 = vpop.permute.xlu0 %721 }
  0xf1   : > { %3665 = vst [vmem:[#allocation6_spill] sm:$0xff] %v2868_v36  ;;  %1666 = vperm.xlu0 %2300, %v2547_v4   ;;  %v726_v32 = vsub.f32 %v2865_v12, %v722_v61 }
  0xf3   : > { %2270 = vset.pattern.permute.xlu1 %v2419_v30  ;;  %v648_v27 = vpop.permute.xlu1 %647 }
  0xf4   : > { %v652_v28 = vadd.f32 %v648_v27, %v2825_v16  ;;  %v653_v23 = vadd.f32 %v648_v27, %v2828_v25  ;;  %1171 = vperm.xlu1 %2270, %v2547_v4  }
  0xf5   : > { %1682 = vperm.xlu0 %2300, %v2542_v3  }
  0xf6   : > { %v656_v8 = vmax.f32 %v611_v50, %v652_v28  ;;  %v657_v9 = vmax.f32 %v612_v51, %v653_v23  ;;  %v727_v50 = vsub.f32 %v2868_v36, %v722_v61  ;;  %v2087_v23 = vld [vmem:[%s2634_s25 + $0x13] ss:$8 sm:$0x3]  ;;  %v763_v61 = vpop.permute.xlu0 %762 }
  0xf8   : > { %v701_v20 = vmax.f32 %v656_v8, %v2858_v13  ;;  %v702_v27 = vmax.f32 %v657_v9, %v698_v19  ;;  %2271 = vset.pattern.permute.xlu1 %v2418_v24  ;;  %v677_v62 = vpop.permute.xlu1 %676  ;;  %v2428_v8 = vmov 21   ;;  %v2885_v9 = vrot.slane %v2087_v23, %v2637_v34 }
  0xf9   : > { %v681_v11 = vsub.f32 %v2842_v41, %v677_v62  ;;  %v682_v18 = vsub.f32 %v2845_v45, %v677_v62  ;;  %1138 = vperm.xlu1 %2271, %v2528_v0   ;;  %v2888_v62 = vrot.slane %v2087_v23, %v2639_v35  ;;  %2304 = vset.pattern.permute.xlu0 %v3635_v33 }
  0xfa   : > { %3666 = vst [vmem:[#allocation7_spill] sm:$0xff] %v2885_v9  ;;  %1707 = vperm.xlu0 %2304, %v2533_v1   ;;  %v783_v60 = vpop.permute.xlu0 %782 }
  0xfb   : > { %v685_v51 = vmin.f32 %v640_v17, %v681_v11  ;;  %v686_v28 = vmin.f32 %v641_v15, %v682_v18  ;;  %3667 = vst [vmem:[#allocation8_spill] sm:$0xff] %v2888_v62  ;;  %v770_v18 = vsub.f32 %v2888_v62, %v763_v61 }
  0xfc   : > { %v2881_v13 = vpop.permute.xlu1 %688 }
  0xfd   : > { %v730_v19 = vmin.f32 %v685_v51, %v726_v32  ;;  %v731_v24 = vmin.f32 %v686_v28, %v727_v50  ;;  %2273 = vset.pattern.permute.xlu1 %v2428_v8  ;;  %v769_v32 = vsub.f32 %v2885_v9, %v763_v61 }
  0xfe   : > { %1212 = vperm.xlu1 %2273, %v2533_v1   ;;  %1723 = vperm.xlu0 %2304, %v2528_v0  }
 0x101   : > { %v718_v11 = vpop.permute.xlu1 %717 }
 0x102   : > { %v724_v17 = vsub.f32 %v2865_v12, %v718_v11  ;;  %v725_v15 = vsub.f32 %v2868_v36, %v718_v11  ;;  %1216 = vperm.xlu1 %2273, %v2547_v4   ;;  %v2088_v11 = vld [vmem:[%s2634_s25 + $0x14] ss:$8 sm:$0x3] }
 0x103   : > { %v2909_v61 = vrot.slane %v2088_v11, %v2637_v34 }
 0x104   : > { %v728_v50 = vmin.f32 %v683_v5, %v724_v17  ;;  %v729_v51 = vmin.f32 %v684_v53, %v725_v15  ;;  %v787_v5 = vadd.f32 %v783_v60, %v2885_v9  ;;  %v788_v53 = vadd.f32 %v783_v60, %v2888_v62 }
 0x105   : > { %v2898_v28 = vpop.permute.xlu1 %733  ;;  %3669 = vst [vmem:[#allocation10_spill] sm:$0xff] %v2909_v61 }
 0x106   : > { %3668 = vst [vmem:[#allocation9_spill] sm:$0xff] %v2898_v28  ;;  %v773_v23 = vmin.f32 %v728_v50, %v769_v32  ;;  %v774_v33 = vmin.f32 %v729_v51, %v770_v18  ;;  %2274 = vset.pattern.permute.xlu1 %v2419_v30  ;;  %v2912_v30 = vrot.slane %v2088_v11, %v2639_v35  ;;  %v812_v32 = vpop.permute.xlu0 %811 }
 0x107   : > { %1187 = vperm.xlu1 %2274, %v2542_v3  }
 0x108   : > { %3670 = vst [vmem:[#allocation11_spill] sm:$0xff] %v2912_v30 }
 0x109   : > { %v738_v14 = vpop.permute.xlu1 %737 }
 0x10a   : > { %v742_v2 = vadd.f32 %v738_v14, %v2865_v12  ;;  %v743_v26 = vadd.f32 %v738_v14, %v2868_v36  ;;  %v817_v36 = vsub.f32 %v2912_v30, %v812_v32 }
 0x10b   : > { %2275 = vset.pattern.permute.xlu1 %v3645_v42  ;;  %v816_v42 = vsub.f32 %v2909_v61, %v812_v32 }
 0x10c   : > { %v746_v17 = vmax.f32 %v701_v20, %v742_v2  ;;  %v747_v15 = vmax.f32 %v702_v27, %v743_v26  ;;  %1257 = vperm.xlu1 %2275, %v2533_v1   ;;  %v2089_v2 = vld [vmem:[%s2634_s25 + $0x15] ss:$8 sm:$0x3] }
 0x10e   : > { %v791_v18 = vmax.f32 %v746_v17, %v787_v5  ;;  %v792_v14 = vmax.f32 %v747_v15, %v788_v53  ;;  %v767_v50 = vpop.permute.xlu1 %766  ;;  %v2924_v5 = vrot.slane %v2089_v2, %v2637_v34  ;;  %v2927_v53 = vrot.slane %v2089_v2, %v2639_v35  ;;  %v853_v17 = vpop.permute.xlu0 %852 }
 0x10f   : > { %v771_v51 = vsub.f32 %v2885_v9, %v767_v50  ;;  %v772_v60 = vsub.f32 %v2888_v62, %v767_v50  ;;  %v3651_v2 = vmov 34  }
 0x110   : > { %2277 = vset.pattern.permute.xlu1 %v2428_v8  ;;  %3672 = vst [vmem:[#allocation13_spill] sm:$0xff] %v2927_v53  ;;  %v3648_v8 = vmov 35  }
 0x111   : > { %v775_v11 = vmin.f32 %v730_v19, %v771_v51  ;;  %v776_v28 = vmin.f32 %v731_v24, %v772_v60  ;;  %1228 = vperm.xlu1 %2277, %v2528_v0   ;;  %2309 = vset.pattern.permute.xlu0 %v3648_v8  ;;  %v3675_v8 = vmov 22  }
 0x112   : > { %v2921_v26 = vpop.permute.xlu1 %778  ;;  %1842 = vperm.xlu0 %2309, %v2533_v1  }
 0x113   : > { %3671 = vst [vmem:[#allocation12_spill] sm:$0xff] %v2921_v26  ;;  %v820_v20 = vmin.f32 %v775_v11, %v816_v42  ;;  %v821_v27 = vmin.f32 %v776_v28, %v817_v36  ;;  %v859_v42 = vsub.f32 %v2924_v5, %v853_v17  ;;  %v860_v36 = vsub.f32 %v2927_v53, %v853_v17  ;;  %v2090_v17 = vld [vmem:[%s2634_s25 + $0x16] ss:$8 sm:$0x3] }
 0x114   : > { %v3673_v28 = vmov 23   ;;  %v2092_v26 = vld [vmem:[%s2634_s25 + $0x20] ss:$8 sm:$0x3] }
 0x115   : > { %1232 = vperm.xlu1 %2277, %v2542_v3  }
 0x116   : > { %2310 = vset.pattern.permute.xlu0 %v3651_v2 }
 0x117   : > { %v808_v15 = vpop.permute.xlu1 %807  ;;  %1801 = vperm.xlu0 %2310, %v2547_v4  }
 0x118   : > { %v814_v19 = vsub.f32 %v2909_v61, %v808_v15  ;;  %v815_v24 = vsub.f32 %v2912_v30, %v808_v15  ;;  %v873_v15 = vpop.permute.xlu0 %872 }
 0x119   : > { %2278 = vset.pattern.permute.xlu1 %v3673_v28 }
 0x11a   : > { %v818_v32 = vmin.f32 %v773_v23, %v814_v19  ;;  %v819_v50 = vmin.f32 %v774_v33, %v815_v24  ;;  %1306 = vperm.xlu1 %2278, %v2547_v4   ;;  %v2948_v19 = vadd.f32 %v873_v15, %v2924_v5  ;;  %v2951_v24 = vadd.f32 %v873_v15, %v2927_v53 }
 0x11b   : > { %v2938_v51 = vpop.permute.xlu1 %823  ;;  %1817 = vperm.xlu0 %2310, %v2542_v3  }
 0x11c   : > { %3674 = vst [vmem:[#allocation14_spill] sm:$0xff] %v2938_v51  ;;  %v863_v60 = vmin.f32 %v818_v32, %v859_v42  ;;  %v864_v11 = vmin.f32 %v819_v50, %v860_v36  ;;  %v2954_v42 = vrot.slane %v2090_v17, %v2637_v34  ;;  %v2957_v36 = vrot.slane %v2090_v17, %v2639_v35  ;;  %v902_v32 = vpop.permute.xlu0 %901 }
 0x11e   : > { %2279 = vset.pattern.permute.xlu1 %v3675_v8  ;;  %v906_v2 = vsub.f32 %v2954_v42, %v902_v32 }
 0x11f   : > { %1273 = vperm.xlu1 %2279, %v2528_v0   ;;  %v828_v62 = vpop.permute.xlu1 %827 }
 0x120   : > { %v832_v33 = vadd.f32 %v828_v62, %v2909_v61  ;;  %v833_v23 = vadd.f32 %v828_v62, %v2912_v30  ;;  %v2432_v62 = vmov 24   ;;  %v2091_v61 = vld [vmem:[%s2634_s25 + $0x17] ss:$8 sm:$0x3]  ;;  %v943_v15 = vpop.permute.xlu0 %942 }
 0x122   : > { %v2960_v0 = vmax.f32 %v791_v18, %v832_v33  ;;  %v2962_v8 = vmax.f32 %v792_v14, %v833_v23  ;;  %v907_v18 = vsub.f32 %v2957_v36, %v902_v32  ;;  %v3676_v23 = vmov 0  }
 0x123   : > { %2281 = vset.pattern.permute.xlu1 %v2432_v62  ;;  %2314 = vset.pattern.permute.xlu0 %v3676_v23  ;;  %v2984_v32 = vrot.slane %v2091_v61, %v2637_v34 }
 0x124   : > { %1347 = vperm.xlu1 %2281, %v2533_v1   ;;  %v857_v17 = vpop.permute.xlu1 %856 }
 0x125   : > { %v861_v14 = vsub.f32 %v2924_v5, %v857_v17  ;;  %v862_v33 = vsub.f32 %v2927_v53, %v857_v17  ;;  %v2987_v17 = vrot.slane %v2091_v61, %v2639_v35 }
 0x127   : > { %v865_v30 = vmin.f32 %v820_v20, %v861_v14  ;;  %v866_v51 = vmin.f32 %v821_v27, %v862_v33  ;;  %v2990_v20 = vrot.slane %v2092_v26, %v2637_v34  ;;  %v2993_v27 = vrot.slane %v2092_v26, %v2639_v35 }
 0x128   : > { %1351 = vperm.xlu1 %2281, %v2547_v4   ;;  %v2976_v50 = vpop.permute.xlu1 %868 }
 0x129   : > { %v2979_v9 = vmin.f32 %v865_v30, %v906_v2  ;;  %v2981_v12 = vmin.f32 %v866_v51, %v907_v18  ;;  %v949_v30 = vsub.f32 %v2984_v32, %v943_v15  ;;  %v950_v51 = vsub.f32 %v2987_v17, %v943_v15  ;;  %v988_v18 = vpop.permute.xlu0 %987 }
 0x12a   : > { %v994_v14 = vsub.f32 %v2990_v20, %v988_v18  ;;  %v995_v33 = vsub.f32 %v2993_v27, %v988_v18  ;;  %v3014_v18 = vld [vmem:[%s3625_s2] sm:$0xff] }
 0x12b   : > { %3677 = vst [vmem:[#allocation15_spill] sm:$0xff] %v2979_v9  ;;  %3678 = vst [vmem:[#allocation16_spill] sm:$0xff] %v2981_v12  ;;  %v3679_v12 = vmov 25  }
 0x12c   : > { %2282 = vset.pattern.permute.xlu1 %v3673_v28 }
 0x12d   : > { %1322 = vperm.xlu1 %2282, %v2542_v3   ;;  %v898_v4 = vpop.permute.xlu1 %897 }
 0x12e   : > { %v904_v2 = vsub.f32 %v2954_v42, %v898_v4  ;;  %v905_v61 = vsub.f32 %v2957_v36, %v898_v4 }
 0x130   : > { %v908_v26 = vmin.f32 %v863_v60, %v904_v2  ;;  %v909_v23 = vmin.f32 %v864_v11, %v905_v61  ;;  %v3022_v11 = vld [vmem:[%s3625_s2 + $0x8] sm:$0xff]  ;;  %v294_v2 = vadd.f32 %v2608_v22, %v2658_v46  ;;  %v295_v61 = vadd.f32 %v2608_v22, %v2661_v47 }
 0x131   : > { %2283 = vset.pattern.permute.xlu1 %v3679_v12  ;;  %v3004_v28 = vpop.permute.xlu1 %913  ;;  %v425_v46 = vadd.f32 %v2741_v7, %v2678_v54  ;;  %v426_v22 = vadd.f32 %v2741_v7, %v2681_v55 }
 0x132   : > { %v953_v3 = vmin.f32 %v908_v26, %v949_v30  ;;  %v954_v9 = vmin.f32 %v909_v23, %v950_v51  ;;  %1392 = vperm.xlu1 %2283, %v2533_v1   ;;  %v335_v23 = vadd.f32 %v2628_v31, %v2650_v43  ;;  %v336_v30 = vadd.f32 %v2628_v31, %v2653_v44  ;;  %v1008_v26 = vpop.permute.xlu0 %1007 }
 0x133   : > { %v380_v43 = vadd.f32 %v2667_v49, %v2664_v48  ;;  %v381_v31 = vadd.f32 %v2667_v49, %v2672_v52  ;;  %v1012_v47 = vadd.f32 %v1008_v26, %v2990_v20  ;;  %v3682_v48 = vmax.f32 %v2960_v0, %v2948_v19  ;;  %v3073_v19 = vld [vmem:[%s3624_s1] sm:$0xff] }
 0x134   : > { %v3007_v15 = vmin.f32 %v953_v3, %v994_v14  ;;  %v3009_v53 = vmin.f32 %v954_v9, %v995_v33  ;;  %v3680_v9 = vmov 26   ;;  %v339_v44 = vmax.f32 %v294_v2, %v335_v23 }
 0x135   : > { %v918_v4 = vpop.permute.xlu1 %917  ;;  %v1013_v3 = vadd.f32 %v1008_v26, %v2993_v27  ;;  %v3683_v49 = vmax.f32 %v2962_v8, %v2951_v24  ;;  %v470_v2 = vadd.f32 %v2763_v40, %v2684_v56  ;;  %v516_v56 = vadd.f32 %v2796_v29, %v2752_v10 }
 0x136   : > { %2285 = vset.pattern.permute.xlu1 %v2432_v62  ;;  %v3031_v62 = vld [vmem:[%s3624_s1 + $0x8] sm:$0xff]  ;;  %v922_v14 = vadd.f32 %v918_v4, %v2954_v42  ;;  %v923_v33 = vadd.f32 %v918_v4, %v2957_v36  ;;  %v384_v55 = vmax.f32 %v339_v44, %v380_v43  ;;  %v605_v10 = vadd.f32 %v2839_v21, %v2801_v38 }
 0x137   : > { %1363 = vperm.xlu1 %2285, %v3014_v18   ;;  %v695_v38 = vadd.f32 %v2881_v13, %v2842_v41 }
 0x138   : > { %v927_v52 = vmax.f32 %v3683_v49, %v923_v33  ;;  %v429_v8 = vmax.f32 %v384_v55, %v425_v46  ;;  %v515_v33 = vadd.f32 %v2796_v29, %v2749_v37  ;;  %v606_v29 = vadd.f32 %v2839_v21, %v2804_v39  ;;  %v3688_v55 = vld [vmem:[#allocation7_spill] sm:$0xff] }
 0x139   : > { %v696_v39 = vadd.f32 %v2881_v13, %v2845_v45  ;;  %v3687_v49 = vmov 28   ;;  %v2093_v13 = vld [vmem:[%s2634_s25 + $0x21] ss:$8 sm:$0x3] }
 0x13a   : > { %v3017_v60 = vpop.permute.xlu1 %946 }
 0x13b   : > { %1367 = vperm.xlu1 %2285, %v3022_v11  }
 0x13e   : > { %v3025_v1 = vpop.permute.xlu1 %958 }
 0x13f   : > { %2286 = vset.pattern.permute.xlu1 %v3680_v9 }
 0x140   : > { %1441 = vperm.xlu1 %2286, %v3031_v62  }
 0x143   : > { %v3038_v51 = vpop.permute.xlu1 %991 }
 0x144   : > { %3681 = vst [vmem:[#allocation17_spill] sm:$0xff] %v3038_v51  ;;  %2287 = vset.pattern.permute.xlu1 %v3679_v12  ;;  %v340_v12 = vmax.f32 %v295_v61, %v336_v30  ;;  %v926_v51 = vmax.f32 %v3682_v48, %v922_v14  ;;  %v2433_v30 = vmov 27   ;;  %v471_v61 = vadd.f32 %v2763_v40, %v2687_v57  ;;  %v3685_v48 = vld [vmem:[#allocation9_spill] sm:$0xff] }
 0x145   : > { %1408 = vperm.xlu1 %2287, %v3014_v18  }
 0x146   : > { %v385_v7 = vmax.f32 %v340_v12, %v381_v31  ;;  %v474_v31 = vmax.f32 %v429_v8, %v470_v2  ;;  %v561_v12 = vadd.f32 %v2813_v6, %v2779_v59  ;;  %v3690_v2 = vld [vmem:[#allocation8_spill] sm:$0xff]  ;;  %v3692_v8 = vld [vmem:[#allocation14_spill] sm:$0xff] }
 0x148   : > { %v963_v4 = vpop.permute.xlu1 %962  ;;  %v430_v14 = vmax.f32 %v385_v7, %v426_v22  ;;  %v519_v37 = vmax.f32 %v474_v31, %v515_v33  ;;  %v3689_v7 = vld [vmem:[#allocation12_spill] sm:$0xff]  ;;  %v3693_v33 = vld [vmem:[#allocation11_spill] sm:$0xff]  ;;  %v2094_v31 = vld [vmem:[%s2634_s25 + $0x22] ss:$8 sm:$0x3] }
 0x149   : > { %v967_v23 = vadd.f32 %v963_v4, %v2984_v32  ;;  %v968_v54 = vadd.f32 %v963_v4, %v2987_v17  ;;  %2289 = vset.pattern.permute.xlu1 %v2433_v30  ;;  %v3684_v4 = vld [vmem:[#allocation5_spill] sm:$0xff]  ;;  %v785_v41 = vadd.f32 %v3689_v7, %v3688_v55  ;;  %v786_v45 = vadd.f32 %v3689_v7, %v3690_v2 }
 0x14a   : > { %1482 = vperm.xlu1 %2289, %v3073_v19   ;;  %v475_v44 = vmax.f32 %v430_v14, %v471_v61 }
 0x14b   : > { %v971_v24 = vmax.f32 %v926_v51, %v967_v23  ;;  %v972_v0 = vmax.f32 %v927_v52, %v968_v54  ;;  %v560_v51 = vadd.f32 %v2813_v6, %v2776_v58  ;;  %v651_v58 = vadd.f32 %v2853_v63, %v2828_v25 }
 0x14c   : > { %v520_v26 = vmax.f32 %v475_v44, %v516_v56  ;;  %v740_v25 = vadd.f32 %v3685_v48, %v3684_v4  ;;  %v831_v56 = vadd.f32 %v3692_v8, %v3693_v33  ;;  %v3122_v44 = vrot.slane %v2093_v13, %v2637_v34 }
 0x14d   : > { %v3080_v43 = vpop.permute.xlu1 %1036  ;;  %v3082_v57 = vmax.f32 %v971_v24, %v1012_v47  ;;  %v3084_v40 = vmax.f32 %v972_v0, %v1013_v3  ;;  %v564_v46 = vmax.f32 %v519_v37, %v560_v51  ;;  %v650_v47 = vadd.f32 %v2853_v63, %v2825_v16  ;;  %v3686_v63 = vld [vmem:[#allocation6_spill] sm:$0xff] }
 0x14e   : > { %1486 = vperm.xlu1 %2289, %v3031_v62   ;;  %v565_v22 = vmax.f32 %v520_v26, %v561_v12  ;;  %v3691_v0 = vld [vmem:[#allocation10_spill] sm:$0xff]  ;;  %v3125_v51 = vrot.slane %v2093_v13, %v2639_v35  ;;  %v965_v4 = vadd.f32 %v3025_v1, %v2984_v32 }
 0x14f   : > { %v609_v6 = vmax.f32 %v564_v46, %v605_v10  ;;  %v830_v14 = vadd.f32 %v3692_v8, %v3691_v0  ;;  %v875_v10 = vadd.f32 %v2976_v50, %v2924_v5  ;;  %v921_v5 = vadd.f32 %v3004_v28, %v2957_v36 }
 0x150   : > { %v610_v3 = vmax.f32 %v565_v22, %v606_v29  ;;  %v3694_v29 = vld [vmem:[#allocation13_spill] sm:$0xff]  ;;  %v1033_v22 = vpop.permute.xlu0 %1032 }
 0x151   : > { %v654_v21 = vmax.f32 %v609_v6, %v650_v47  ;;  %v876_v46 = vadd.f32 %v2976_v50, %v3694_v29  ;;  %v3134_v47 = vrot.slane %v2094_v31, %v2637_v34  ;;  %v3697_v29 = vld [vmem:[#allocation15_spill] sm:$0xff] }
 0x152   : > { %2290 = vset.pattern.permute.xlu1 %v3680_v9  ;;  %v1004_v59 = vpop.permute.xlu1 %1003  ;;  %v655_v16 = vmax.f32 %v610_v3, %v651_v58  ;;  %v741_v9 = vadd.f32 %v3685_v48, %v3686_v63  ;;  %v3137_v58 = vrot.slane %v2094_v31, %v2639_v35  ;;  %v966_v48 = vadd.f32 %v3025_v1, %v2987_v17 }
 0x153   : > { %1457 = vperm.xlu1 %2290, %v3022_v11   ;;  %v699_v23 = vmax.f32 %v654_v21, %v695_v38  ;;  %v920_v38 = vadd.f32 %v3004_v28, %v2954_v42  ;;  %v1040_v21 = vsub.f32 %v3125_v51, %v1033_v22  ;;  %v1011_v55 = vadd.f32 %v1004_v59, %v2993_v27 }
 0x154   : > { %v700_v54 = vmax.f32 %v655_v16, %v696_v39  ;;  %v1039_v39 = vsub.f32 %v3122_v44, %v1033_v22  ;;  %v3698_v22 = vld [vmem:[#allocation16_spill] sm:$0xff] }
 0x155   : > { %v744_v61 = vmax.f32 %v699_v23, %v740_v25  ;;  %v2095_v25 = vld [vmem:[%s2634_s25 + $0x23] ss:$8 sm:$0x3]  ;;  %v1044_v2 = vmin.f32 %v3009_v53, %v1040_v21 }
 0x156   : > { %v745_v24 = vmax.f32 %v700_v54, %v741_v9  ;;  %v1010_v54 = vadd.f32 %v1004_v59, %v2990_v20  ;;  %v3169_v13 = vrot.slane %v2095_v25, %v2637_v34  ;;  %v951_v59 = vsub.f32 %v2984_v32, %v3017_v60 }
 0x157   : > { %2291 = vset.pattern.permute.xlu1 %v3687_v49  ;;  %v1078_v52 = vpop.permute.xlu1 %1077  ;;  %v789_v37 = vmax.f32 %v744_v61, %v785_v41  ;;  %v1043_v41 = vmin.f32 %v3007_v15, %v1039_v39 }
 0x158   : > { %1527 = vperm.xlu1 %2291, %v3073_v19   ;;  %v790_v26 = vmax.f32 %v745_v24, %v786_v45  ;;  %v1084_v9 = vsub.f32 %v3134_v47, %v1078_v52  ;;  %v1085_v23 = vsub.f32 %v3137_v58, %v1078_v52  ;;  %v1049_v45 = vpop.permute.xlu0 %1048  ;;  %v3172_v52 = vrot.slane %v2095_v25, %v2639_v35 }
 0x159   : > { %v834_v6 = vmax.f32 %v789_v37, %v830_v14  ;;  %v1055_v32 = vadd.f32 %v1049_v45, %v3122_v44  ;;  %v1056_v31 = vadd.f32 %v1049_v45, %v3125_v51 }
 0x15a   : > { %v835_v3 = vmax.f32 %v790_v26, %v831_v56  ;;  %v1088_v0 = vmin.f32 %v1043_v41, %v1084_v9  ;;  %v1089_v53 = vmin.f32 %v1044_v2, %v1085_v23 }
 0x15b   : > { %v3127_v12 = vpop.permute.xlu1 %1081  ;;  %v879_v50 = vmax.f32 %v834_v6, %v875_v10 }
 0x15c   : > { %2293 = vset.pattern.permute.xlu1 %v2433_v30  ;;  %v880_v30 = vmax.f32 %v835_v3, %v876_v46  ;;  %v955_v46 = vmin.f32 %v3697_v29, %v951_v59  ;;  %v1041_v3 = vsub.f32 %v3122_v44, %v3080_v43 }
 0x15d   : > { %1498 = vperm.xlu1 %2293, %v3014_v18   ;;  %v924_v36 = vmax.f32 %v879_v50, %v920_v38  ;;  %v1042_v38 = vsub.f32 %v3125_v51, %v3080_v43  ;;  %v1087_v43 = vsub.f32 %v3137_v58, %v3127_v12 }
 0x15e   : > { %v925_v28 = vmax.f32 %v880_v30, %v921_v5  ;;  %v1127_v5 = vpop.permute.xlu0 %1126 }
 0x15f   : > { %v969_v61 = vmax.f32 %v924_v36, %v965_v4  ;;  %v1131_v41 = vsub.f32 %v3169_v13, %v1127_v5  ;;  %v1132_v2 = vsub.f32 %v3172_v52, %v1127_v5 }
 0x160   : > { %v1053_v16 = vpop.permute.xlu1 %1052  ;;  %v970_v24 = vmax.f32 %v925_v28, %v966_v48  ;;  %v2096_v28 = vld [vmem:[%s2634_s25 + $0x24] ss:$8 sm:$0x3] }
 0x161   : > { %v3152_v63 = vadd.f32 %v1053_v16, %v3122_v44  ;;  %v3155_v42 = vadd.f32 %v1053_v16, %v3125_v51  ;;  %1502 = vperm.xlu1 %2293, %v3022_v11   ;;  %v1014_v33 = vmax.f32 %v969_v61, %v1010_v54  ;;  %v1086_v44 = vsub.f32 %v3134_v47, %v3127_v12 }
 0x162   : > { %v1015_v56 = vmax.f32 %v970_v24, %v1011_v55  ;;  %v1143_v25 = vpop.permute.xlu0 %1142  ;;  %v2434_v54 = vmov 30   ;;  %v1163_v61 = vrot.slane %v2096_v28, %v2639_v35 }
 0x163   : > { %v1061_v1 = vmax.f32 %v3082_v57, %v3152_v63  ;;  %v1062_v7 = vmax.f32 %v3084_v40, %v3155_v42  ;;  %v952_v57 = vsub.f32 %v2987_v17, %v3017_v60  ;;  %v3695_v40 = vmov 29   ;;  %v3696_v17 = vld [vmem:[#allocation17_spill] sm:$0xff] }
 0x164   : > { %v996_v60 = vsub.f32 %v2990_v20, %v3696_v17  ;;  %v997_v37 = vsub.f32 %v2993_v27, %v3696_v17  ;;  %v1059_v50 = vmax.f32 %v1014_v33, %v1055_v32  ;;  %v1060_v27 = vmax.f32 %v1015_v56, %v1056_v31  ;;  %v2097_v32 = vld [vmem:[%s2634_s25 + $0x25] ss:$8 sm:$0x3] }
 0x165   : > { %2294 = vset.pattern.permute.xlu1 %v3695_v40  ;;  %v1123_v15 = vpop.permute.xlu1 %1122  ;;  %v956_v6 = vmin.f32 %v3698_v22, %v952_v57  ;;  %v1147_v42 = vadd.f32 %v1143_v25, %v3169_v13  ;;  %v1148_v36 = vadd.f32 %v1143_v25, %v3172_v52  ;;  %v1159_v57 = vrot.slane %v2096_v28, %v2637_v34 }
 0x166   : > { %v1129_v8 = vsub.f32 %v3169_v13, %v1123_v15  ;;  %v1130_v14 = vsub.f32 %v3172_v52, %v1123_v15  ;;  %1576 = vperm.xlu1 %2294, %v3031_v62   ;;  %v1000_v21 = vmin.f32 %v955_v46, %v996_v60  ;;  %v1168_v56 = vpop.permute.xlu0 %1167  ;;  %v1208_v29 = vrot.slane %v2097_v32, %v2639_v35 }
 0x167   : > { %v1001_v16 = vmin.f32 %v956_v6, %v997_v37  ;;  %v1174_v17 = vsub.f32 %v1159_v57, %v1168_v56  ;;  %v1175_v60 = vsub.f32 %v1163_v61, %v1168_v56  ;;  %v1204_v37 = vrot.slane %v2097_v32, %v2637_v34 }
 0x168   : > { %v3188_v26 = vmin.f32 %v1088_v0, %v1129_v8  ;;  %v3190_v10 = vmin.f32 %v1089_v53, %v1130_v14  ;;  %v1045_v4 = vmin.f32 %v1000_v21, %v1041_v3  ;;  %v3699_v6 = vmov 31  }
 0x169   : > { %v1046_v48 = vmin.f32 %v1001_v16, %v1042_v38  ;;  %v3700_v25 = vmov 32  }
 0x16a   : > { %2295 = vset.pattern.permute.xlu1 %v3687_v49  ;;  %v1094_v20 = vpop.permute.xlu1 %1093  ;;  %v1090_v12 = vmin.f32 %v1045_v4, %v1086_v44  ;;  %v2098_v44 = vld [vmem:[%s2634_s25 + $0x26] ss:$8 sm:$0x3] }
 0x16b   : > { %v1100_v30 = vadd.f32 %v1094_v20, %v3134_v47  ;;  %v1101_v39 = vadd.f32 %v1094_v20, %v3137_v58  ;;  %1543 = vperm.xlu1 %2295, %v3014_v18   ;;  %v1091_v55 = vmin.f32 %v1046_v48, %v1087_v43  ;;  %v3242_v4 = vrot.slane %v2098_v44, %v2637_v34 }
 0x16c   : > { %v1135_v15 = vmin.f32 %v1090_v12, %v1131_v41  ;;  %v3245_v48 = vrot.slane %v2098_v44, %v2639_v35 }
 0x16d   : > { %v3206_v51 = vmax.f32 %v1059_v50, %v1100_v30  ;;  %v3208_v49 = vmax.f32 %v1060_v27, %v1101_v39  ;;  %v1136_v0 = vmin.f32 %v1091_v55, %v1132_v2 }
 0x16e   : > { %v1098_v63 = vpop.permute.xlu1 %1097 }
 0x16f   : > { %v1102_v9 = vadd.f32 %v1098_v63, %v3134_v47  ;;  %v1103_v23 = vadd.f32 %v1098_v63, %v3137_v58  ;;  %2297 = vset.pattern.permute.xlu1 %v2434_v54 }
 0x170   : > { %1617 = vperm.xlu1 %2297, %v3073_v19  }
 0x171   : > { %v1106_v45 = vmax.f32 %v1061_v1, %v1102_v9  ;;  %v1107_v59 = vmax.f32 %v1062_v7, %v1103_v23 }
 0x173   : > { %v1172_v47 = vpop.permute.xlu1 %1171  ;;  %v1151_v24 = vmax.f32 %v1106_v45, %v1147_v42  ;;  %v1152_v58 = vmax.f32 %v1107_v59, %v1148_v36 }
 0x174   : > { %v1176_v53 = vsub.f32 %v1159_v57, %v1172_v47  ;;  %v1177_v8 = vsub.f32 %v1163_v61, %v1172_v47  ;;  %1621 = vperm.xlu1 %2297, %v3031_v62  }
 0x176   : > { %v1180_v14 = vmin.f32 %v1135_v15, %v1176_v53  ;;  %v1181_v33 = vmin.f32 %v1136_v0, %v1177_v8  ;;  %v2099_v15 = vld [vmem:[%s2634_s25 + $0x27] ss:$8 sm:$0x3] }
 0x177   : > { %v1294_v32 = vrot.slane %v2099_v15, %v2637_v34 }
 0x178   : > { %2298 = vset.pattern.permute.xlu1 %v3695_v40  ;;  %v1139_v1 = vpop.permute.xlu1 %1138 }
 0x179   : > { %v1145_v7 = vadd.f32 %v1139_v1, %v3169_v13  ;;  %v1146_v31 = vadd.f32 %v1139_v1, %v3172_v52  ;;  %1592 = vperm.xlu1 %2298, %v3022_v11   ;;  %v1178_v13 = vmin.f32 %v3188_v26, %v1174_v17  ;;  %v1179_v52 = vmin.f32 %v3190_v10, %v1175_v60 }
 0x17a   : > { %v1298_v1 = vrot.slane %v2099_v15, %v2639_v35 }
 0x17b   : > { %v1149_v46 = vmax.f32 %v3206_v51, %v1145_v7  ;;  %v1150_v22 = vmax.f32 %v3208_v49, %v1146_v31  ;;  %v1184_v49 = vpop.permute.xlu0 %1183 }
 0x17c   : > { %v1190_v28 = vadd.f32 %v1184_v49, %v1159_v57  ;;  %v1191_v9 = vadd.f32 %v1184_v49, %v1163_v61 }
 0x17d   : > { %2299 = vset.pattern.permute.xlu1 %v3699_v6  ;;  %v1213_v40 = vpop.permute.xlu1 %1212 }
 0x17e   : > { %v1219_v3 = vsub.f32 %v1204_v37, %v1213_v40  ;;  %v1220_v38 = vsub.f32 %v1208_v29, %v1213_v40  ;;  %1662 = vperm.xlu1 %2299, %v3073_v19   ;;  %v1194_v55 = vmax.f32 %v1149_v46, %v1190_v28  ;;  %v1195_v41 = vmax.f32 %v1150_v22, %v1191_v9 }
 0x17f   : > { %v1262_v59 = vpop.permute.xlu0 %1261 }
 0x180   : > { %v1223_v5 = vmin.f32 %v1178_v13, %v1219_v3  ;;  %v1224_v20 = vmin.f32 %v1179_v52, %v1220_v38  ;;  %v1267_v8 = vsub.f32 %v3245_v48, %v1262_v59 }
 0x181   : > { %v1217_v50 = vpop.permute.xlu1 %1216 }
 0x182   : > { %v1221_v27 = vsub.f32 %v1204_v37, %v1217_v50  ;;  %v1222_v30 = vsub.f32 %v1208_v29, %v1217_v50  ;;  %2301 = vset.pattern.permute.xlu1 %v2434_v54 }
 0x183   : > { %1633 = vperm.xlu1 %2301, %v3014_v18  }
 0x184   : > { %v1225_v39 = vmin.f32 %v1180_v14, %v1221_v27  ;;  %v1226_v21 = vmin.f32 %v1181_v33, %v1222_v30  ;;  %v1278_v14 = vpop.permute.xlu0 %1277  ;;  %v3701_v30 = vmov 34  }
 0x186   : > { %v1188_v16 = vpop.permute.xlu1 %1187  ;;  %v1271_v17 = vmin.f32 %v1226_v21, %v1267_v8 }
 0x187   : > { %v1192_v43 = vadd.f32 %v1188_v16, %v1159_v57  ;;  %v1193_v26 = vadd.f32 %v1188_v16, %v1163_v61  ;;  %1637 = vperm.xlu1 %2301, %v3022_v11   ;;  %v2435_v57 = vmov 33   ;;  %v1266_v61 = vsub.f32 %v3242_v4, %v1262_v59 }
 0x188   : > { %v1303_v22 = vpop.permute.xlu0 %1302 }
 0x189   : > { %v3237_v10 = vmax.f32 %v1151_v24, %v1192_v43  ;;  %v3239_v51 = vmax.f32 %v1152_v58, %v1193_v26  ;;  %v1270_v31 = vmin.f32 %v1225_v39, %v1266_v61  ;;  %v1309_v3 = vsub.f32 %v1294_v32, %v1303_v22 }
 0x18a   : > { %v1310_v38 = vsub.f32 %v1298_v1, %v1303_v22 }
 0x18b   : > { %2302 = vset.pattern.permute.xlu1 %v3700_v25  ;;  %v1258_v63 = vpop.permute.xlu1 %1257 }
 0x18c   : > { %v1264_v42 = vsub.f32 %v3242_v4, %v1258_v63  ;;  %v1265_v36 = vsub.f32 %v3245_v48, %v1258_v63  ;;  %1711 = vperm.xlu1 %2302, %v3031_v62   ;;  %v1282_v63 = vadd.f32 %v1278_v14, %v3242_v4 }
 0x18e   : > { %v1268_v23 = vmin.f32 %v1223_v5, %v1264_v42  ;;  %v1269_v54 = vmin.f32 %v1224_v20, %v1265_v36  ;;  %v1283_v42 = vadd.f32 %v1278_v14, %v3245_v48 }
 0x190   : > { %2303 = vset.pattern.permute.xlu1 %v3699_v6  ;;  %v1229_v12 = vpop.permute.xlu1 %1228  ;;  %v2100_v6 = vld [vmem:[%s2634_s25 + $0x30] ss:$8 sm:$0x3]  ;;  %v1313_v21 = vmin.f32 %v1268_v23, %v1309_v3  ;;  %v1314_v16 = vmin.f32 %v1269_v54, %v1310_v38  ;;  %v2101_v23 = vld [vmem:[%s2634_s25 + $0x31] ss:$8 sm:$0x3] }
 0x191   : > { %v1235_v2 = vadd.f32 %v1229_v12, %v1204_v37  ;;  %v1236_v45 = vadd.f32 %v1229_v12, %v1208_v29  ;;  %1678 = vperm.xlu1 %2303, %v3014_v18   ;;  %v1339_v5 = vrot.slane %v2100_v6, %v2637_v34  ;;  %v1343_v20 = vrot.slane %v2100_v6, %v2639_v35 }
 0x192   : > { %v3277_v59 = vrot.slane %v2101_v23, %v2637_v34 }
 0x193   : > { %v1239_v47 = vmax.f32 %v1194_v55, %v1235_v2  ;;  %v1240_v24 = vmax.f32 %v1195_v41, %v1236_v45  ;;  %v1319_v45 = vpop.permute.xlu0 %1318 }
 0x194   : > { %v1233_v58 = vpop.permute.xlu1 %1232  ;;  %v1325_v15 = vadd.f32 %v1319_v45, %v1294_v32 }
 0x195   : > { %v1237_v0 = vadd.f32 %v1233_v58, %v1204_v37  ;;  %v1238_v53 = vadd.f32 %v1233_v58, %v1208_v29  ;;  %2305 = vset.pattern.permute.xlu1 %v2435_v57 }
 0x196   : > { %1752 = vperm.xlu1 %2305, %v3073_v19  }
 0x197   : > { %v1241_v33 = vmax.f32 %v3237_v10, %v1237_v0  ;;  %v1242_v56 = vmax.f32 %v3239_v51, %v1238_v53  ;;  %v1326_v0 = vadd.f32 %v1319_v45, %v1298_v1 }
 0x199   : > { %v1307_v7 = vpop.permute.xlu1 %1306  ;;  %v1286_v54 = vmax.f32 %v1241_v33, %v1282_v63  ;;  %v1287_v12 = vmax.f32 %v1242_v56, %v1283_v42 }
 0x19a   : > { %v1311_v60 = vsub.f32 %v1294_v32, %v1307_v7  ;;  %v1312_v37 = vsub.f32 %v1298_v1, %v1307_v7  ;;  %1756 = vperm.xlu1 %2305, %v3031_v62   ;;  %v1397_v7 = vpop.permute.xlu0 %1396 }
 0x19c   : > { %v1315_v29 = vmin.f32 %v1270_v31, %v1311_v60  ;;  %v1316_v46 = vmin.f32 %v1271_v17, %v1312_v37  ;;  %v2102_v60 = vld [vmem:[%s2634_s25 + $0x32] ss:$8 sm:$0x3]  ;;  %v1401_v37 = vsub.f32 %v3277_v59, %v1397_v7 }
 0x19e   : > { %2306 = vset.pattern.permute.xlu1 %v3700_v25  ;;  %v1274_v40 = vpop.permute.xlu1 %1273 }
 0x19f   : > { %v1280_v13 = vadd.f32 %v1274_v40, %v3242_v4  ;;  %v1281_v52 = vadd.f32 %v1274_v40, %v3245_v48  ;;  %1727 = vperm.xlu1 %2306, %v3022_v11   ;;  %v3280_v4 = vrot.slane %v2101_v23, %v2639_v35  ;;  %v3702_v48 = vmov 35   ;;  %v1876_v23 = vld [vmem:[%s3627_s4 + $0x8] sm:$0xff] }
 0x1a0   : > { %v1429_v40 = vrot.slane %v2102_v60, %v2637_v34 }
 0x1a1   : > { %v1284_v50 = vmax.f32 %v1239_v47, %v1280_v13  ;;  %v1285_v27 = vmax.f32 %v1240_v24, %v1281_v52  ;;  %v1433_v13 = vrot.slane %v2102_v60, %v2639_v35 }
 0x1a3   : > { %2307 = vset.pattern.permute.xlu1 %v3701_v30  ;;  %v1348_v39 = vpop.permute.xlu1 %1347  ;;  %v1329_v8 = vmax.f32 %v1284_v50, %v1325_v15  ;;  %v1330_v14 = vmax.f32 %v1285_v27, %v1326_v0 }
 0x1a4   : > { %v1354_v44 = vsub.f32 %v1339_v5, %v1348_v39  ;;  %v1355_v43 = vsub.f32 %v1343_v20, %v1348_v39  ;;  %1797 = vperm.xlu1 %2307, %v3073_v19   ;;  %v2103_v39 = vld [vmem:[%s2634_s25 + $0x33] ss:$8 sm:$0x3] }
 0x1a6   : > { %v1358_v26 = vmin.f32 %v1313_v21, %v1354_v44  ;;  %v1359_v10 = vmin.f32 %v1314_v16, %v1355_v43 }
 0x1a7   : > { %v1352_v51 = vpop.permute.xlu1 %1351 }
 0x1a8   : > { %v1356_v49 = vsub.f32 %v1339_v5, %v1352_v51  ;;  %v1357_v25 = vsub.f32 %v1343_v20, %v1352_v51  ;;  %2308 = vset.pattern.permute.xlu1 %v2435_v57  ;;  %v1478_v51 = vrot.slane %v2103_v39, %v2639_v35 }
 0x1a9   : > { %1768 = vperm.xlu1 %2308, %v3014_v18  }
 0x1aa   : > { %v1360_v36 = vmin.f32 %v1315_v29, %v1356_v49  ;;  %v1361_v28 = vmin.f32 %v1316_v46, %v1357_v25  ;;  %v1402_v29 = vsub.f32 %v3280_v4, %v1397_v7  ;;  %v1413_v46 = vpop.permute.xlu0 %1412  ;;  %v2436_v25 = vmov 0.0  }
 0x1ab   : > { %1958 = vmatprep.mubr.f32.mxu0 %v2436_v25  ;;  %1964 = vmatprep.mubr.f32.mxu1 %v2436_v25  ;;  %v1417_v45 = vadd.f32 %v1413_v46, %v3277_v59 }
 0x1ac   : > { %v1323_v9 = vpop.permute.xlu1 %1322  ;;  %v1405_v3 = vmin.f32 %v1360_v36, %v1401_v37  ;;  %v1406_v38 = vmin.f32 %v1361_v28, %v1402_v29 }
 0x1ad   : > { %v1327_v55 = vadd.f32 %v1323_v9, %v1294_v32  ;;  %v1328_v19 = vadd.f32 %v1323_v9, %v1298_v1  ;;  %1772 = vperm.xlu1 %2308, %v3022_v11  }
 0x1af   : > { %v1331_v41 = vmax.f32 %v1286_v54, %v1327_v55  ;;  %v1332_v2 = vmax.f32 %v1287_v12, %v1328_v19  ;;  %v1875_v54 = vld [vmem:[%s3627_s4] sm:$0xff] }
 0x1b0   : > { %1879 = vperm.xlu0 %2314, %v1875_v54  }
 0x1b1   : > { %2311 = vset.pattern.permute.xlu1 %v3702_v48  ;;  %v1393_v47 = vpop.permute.xlu1 %1392 }
 0x1b2   : > { %v1399_v24 = vsub.f32 %v3277_v59, %v1393_v47  ;;  %v1400_v58 = vsub.f32 %v3280_v4, %v1393_v47  ;;  %1846 = vperm.xlu1 %2311, %v3031_v62  }
 0x1b4   : > { %v1403_v53 = vmin.f32 %v1358_v26, %v1399_v24  ;;  %v1404_v57 = vmin.f32 %v1359_v10, %v1400_v58  ;;  %v1474_v10 = vrot.slane %v2103_v39, %v2637_v34 }
 0x1b6   : > { %2312 = vset.pattern.permute.xlu1 %v3701_v30  ;;  %v1364_v61 = vpop.permute.xlu1 %1363  ;;  %v1438_v30 = vpop.permute.xlu0 %1437 }
 0x1b7   : > { %v1370_v33 = vadd.f32 %v1364_v61, %v1339_v5  ;;  %v1371_v56 = vadd.f32 %v1364_v61, %v1343_v20  ;;  %1813 = vperm.xlu1 %2312, %v3014_v18   ;;  %v1444_v43 = vsub.f32 %v1429_v40, %v1438_v30  ;;  %v1445_v26 = vsub.f32 %v1433_v13, %v1438_v30 }
 0x1b9   : > { %v3288_v31 = vmax.f32 %v1329_v8, %v1370_v33  ;;  %v3290_v17 = vmax.f32 %v1330_v14, %v1371_v56  ;;  %v1448_v42 = vmin.f32 %v1403_v53, %v1444_v43  ;;  %v1449_v36 = vmin.f32 %v1404_v57, %v1445_v26  ;;  %v2104_v43 = vld [vmem:[%s2634_s25 + $0x34] ss:$8 sm:$0x3] }
 0x1ba   : > { %v1368_v62 = vpop.permute.xlu1 %1367  ;;  %v1454_v14 = vpop.permute.xlu0 %1453 }
 0x1bb   : > { %v1372_v32 = vadd.f32 %v1368_v62, %v1339_v5  ;;  %v1373_v1 = vadd.f32 %v1368_v62, %v1343_v20  ;;  %2313 = vset.pattern.permute.xlu1 %v3702_v48  ;;  %v1418_v48 = vadd.f32 %v1413_v46, %v3280_v4  ;;  %v1460_v56 = vadd.f32 %v1454_v14, %v1429_v40 }
 0x1bc   : > { %1858 = vperm.xlu1 %2313, %v3014_v18   ;;  %v3703_v18 = vmov 0   ;;  %v1461_v7 = vadd.f32 %v1454_v14, %v1433_v13 }
 0x1bd   : > { %v1376_v22 = vmax.f32 %v1331_v41, %v1372_v32  ;;  %v1377_v6 = vmax.f32 %v1332_v2, %v1373_v1 }
 0x1bf   : > { %v1442_v52 = vpop.permute.xlu1 %1441  ;;  %v1421_v15 = vmax.f32 %v1376_v22, %v1417_v45  ;;  %v1422_v0 = vmax.f32 %v1377_v6, %v1418_v48  ;;  %v2109_v22 = vld [vmem:[%s2634_s25 + $0x41] ss:$8 sm:$0x3] }
 0x1c0   : > { %v1446_v5 = vsub.f32 %v1429_v40, %v1442_v52  ;;  %v1447_v20 = vsub.f32 %v1433_v13, %v1442_v52  ;;  %1862 = vperm.xlu1 %2313, %v3022_v11   ;;  %v3469_v32 = vrot.slane %v2109_v22, %v2637_v34  ;;  %v3472_v60 = vrot.slane %v2109_v22, %v2639_v35 }
 0x1c2   : > { %v1450_v50 = vmin.f32 %v1405_v3, %v1446_v5  ;;  %v1451_v27 = vmin.f32 %v1406_v38, %v1447_v20  ;;  %v1532_v5 = vpop.permute.xlu0 %1531 }
 0x1c4   : > { %v1409_v21 = vpop.permute.xlu1 %1408  ;;  %2315 = vset.pattern.permute.xlu1 %v3703_v18 }
 0x1c5   : > { %v1415_v16 = vadd.f32 %v1409_v21, %v3277_v59  ;;  %v1416_v44 = vadd.f32 %v1409_v21, %v3280_v4  ;;  %1884 = vperm.xlu1 %2315, %v1876_v23  }
 0x1c6   : > { %v1548_v20 = vpop.permute.xlu0 %1547 }
 0x1c7   : > { %v1419_v49 = vmax.f32 %v3288_v31, %v1415_v16  ;;  %v1420_v11 = vmax.f32 %v3290_v17, %v1416_v44 }
 0x1c9   : > { %v1483_v63 = vpop.permute.xlu1 %1482  ;;  %v3328_v31 = vmax.f32 %v1419_v49, %v1460_v56  ;;  %v3330_v4 = vmax.f32 %v1420_v11, %v1461_v7  ;;  %v1523_v49 = vrot.slane %v2104_v43, %v2639_v35  ;;  %v2107_v11 = vld [vmem:[%s2634_s25 + $0x37] ss:$8 sm:$0x3] }
 0x1ca   : > { %v1489_v28 = vsub.f32 %v1474_v10, %v1483_v63  ;;  %v1490_v9 = vsub.f32 %v1478_v51, %v1483_v63  ;;  %v1573_v30 = vpop.permute.xlu0 %1572 }
 0x1cb   : > { %v3396_v48 = vadd.f32 %v1548_v20, %v1523_v49 }
 0x1cc   : > { %v3314_v12 = vmin.f32 %v1448_v42, %v1489_v28  ;;  %v3316_v55 = vmin.f32 %v1449_v36, %v1490_v9  ;;  %v2106_v9 = vld [vmem:[%s2634_s25 + $0x36] ss:$8 sm:$0x3] }
 0x1cd   : > { %v1487_v19 = vpop.permute.xlu1 %1486 }
 0x1ce   : > { %v1491_v41 = vsub.f32 %v1474_v10, %v1487_v19  ;;  %v1492_v2 = vsub.f32 %v1478_v51, %v1487_v19  ;;  %v1589_v21 = vpop.permute.xlu0 %1588  ;;  %v1537_v19 = vsub.f32 %v1523_v49, %v1532_v5 }
 0x1d0   : > { %v3320_v47 = vmin.f32 %v1450_v50, %v1491_v41  ;;  %v3322_v24 = vmin.f32 %v1451_v27, %v1492_v2  ;;  %v3389_v41 = vrot.slane %v2107_v11, %v2637_v34  ;;  %v3392_v2 = vrot.slane %v2107_v11, %v2639_v35 }
 0x1d2   : > { %v1458_v58 = vpop.permute.xlu1 %1457  ;;  %v3366_v18 = vpop.permute.xlu0 %1666 }
 0x1d3   : > { %v1462_v53 = vadd.f32 %v1458_v58, %v1429_v40  ;;  %v1463_v57 = vadd.f32 %v1458_v58, %v1433_v13  ;;  %v3399_v58 = vrot.slane %v2106_v9, %v2637_v34 }
 0x1d5   : > { %v3324_v61 = vmax.f32 %v1421_v15, %v1462_v53  ;;  %v3326_v8 = vmax.f32 %v1422_v0, %v1463_v57  ;;  %v3402_v15 = vrot.slane %v2106_v9, %v2639_v35 }
 0x1d6   : > { %v1683_v44 = vpop.permute.xlu0 %1682 }
 0x1d7   : > { %v1528_v33 = vpop.permute.xlu1 %1527 }
 0x1d8   : > { %v1535_v42 = vsub.f32 %v1523_v49, %v1528_v33 }
 0x1da   : > { %v3386_v23 = vpop.permute.xlu0 %1707  ;;  %v1539_v53 = vmin.f32 %v3316_v55, %v1535_v42  ;;  %v2108_v55 = vld [vmem:[%s2634_s25 + $0x40] ss:$8 sm:$0x3] }
 0x1db   : > { %v3439_v42 = vrot.slane %v2108_v55, %v2637_v34 }
 0x1dc   : > { %v1499_v59 = vpop.permute.xlu1 %1498 }
 0x1dd   : > { %v3332_v17 = vadd.f32 %v1499_v59, %v1474_v10  ;;  %v3334_v62 = vadd.f32 %v1499_v59, %v1478_v51  ;;  %v1714_v46 = vsub.f32 %v3439_v42, %v3386_v23 }
 0x1e0   : > { %v1503_v1 = vpop.permute.xlu1 %1502 }
 0x1e1   : > { %v3340_v37 = vadd.f32 %v1503_v1, %v1474_v10  ;;  %v3342_v29 = vadd.f32 %v1503_v1, %v1478_v51  ;;  %v2105_v10 = vld [vmem:[%s2634_s25 + $0x35] ss:$8 sm:$0x3]  ;;  %v1519_v51 = vrot.slane %v2104_v43, %v2637_v34  ;;  %v1672_v43 = vsub.f32 %v3392_v2, %v3366_v18 }
 0x1e2   : > { %v3380_v36 = vrot.slane %v2105_v10, %v2637_v34  ;;  %v3383_v28 = vrot.slane %v2105_v10, %v2639_v35 }
 0x1e3   : > { %v1534_v63 = vsub.f32 %v1519_v51, %v1528_v33  ;;  %v1536_v54 = vsub.f32 %v1519_v51, %v1532_v5  ;;  %v3394_v45 = vadd.f32 %v1548_v20, %v1519_v51  ;;  %v3408_v33 = vpop.permute.xlu0 %1723  ;;  %v1541_v20 = vmin.f32 %v3322_v24, %v1537_v19  ;;  %v2111_v24 = vld [vmem:[%s2634_s25 + $0x43] ss:$8 sm:$0x3] }
 0x1e4   : > { %v1579_v57 = vsub.f32 %v3380_v36, %v1573_v30  ;;  %v1580_v14 = vsub.f32 %v3383_v28, %v1573_v30  ;;  %v3417_v1 = vadd.f32 %v1589_v21, %v3380_v36  ;;  %v1671_v30 = vsub.f32 %v3389_v41, %v3366_v18 }
 0x1e5   : > { %v3348_v6 = vpop.permute.xlu1 %1576  ;;  %v1538_v0 = vmin.f32 %v3314_v12, %v1534_v63  ;;  %v3420_v12 = vadd.f32 %v1589_v21, %v3383_v28  ;;  %v1540_v5 = vmin.f32 %v3320_v47, %v1536_v54  ;;  %v3442_v18 = vrot.slane %v2108_v55, %v2639_v35 }
 0x1e6   : > { %v1581_v7 = vsub.f32 %v3380_v36, %v3348_v6  ;;  %v1582_v59 = vsub.f32 %v3383_v28, %v3348_v6  ;;  %v1584_v63 = vmin.f32 %v1539_v53, %v1580_v14  ;;  %v3453_v53 = vadd.f32 %v1683_v44, %v3392_v2 }
 0x1e7   : > { %v1583_v11 = vmin.f32 %v1538_v0, %v1579_v57  ;;  %v3450_v0 = vadd.f32 %v1683_v44, %v3389_v41  ;;  %v3455_v57 = vpop.permute.xlu0 %1842  ;;  %v3458_v14 = vrot.slane %v2111_v24, %v2637_v34  ;;  %v1715_v44 = vsub.f32 %v3442_v18, %v3386_v23 }
 0x1e8   : > { %v1585_v9 = vmin.f32 %v1540_v5, %v1581_v7  ;;  %v1586_v54 = vmin.f32 %v1541_v20, %v1582_v59  ;;  %v3461_v7 = vrot.slane %v2111_v24, %v2639_v35  ;;  %v2110_v20 = vld [vmem:[%s2634_s25 + $0x42] ss:$8 sm:$0x3] }
 0x1e9   : > { %v3481_v23 = vrot.slane %v2110_v20, %v2637_v34 }
 0x1ea   : > { %v3350_v40 = vpop.permute.xlu1 %1543 }
 0x1eb   : > { %v1550_v24 = vadd.f32 %v3350_v40, %v1519_v51 }
 0x1ef   : > { %v3352_v13 = vpop.permute.xlu1 %1617 }
 0x1f0   : > { %v1624_v6 = vsub.f32 %v3399_v58, %v3352_v13  ;;  %v1625_v10 = vsub.f32 %v3402_v15, %v3352_v13 }
 0x1f2   : > { %v1628_v59 = vmin.f32 %v1583_v11, %v1624_v6  ;;  %v1629_v55 = vmin.f32 %v1584_v63, %v1625_v10  ;;  %v1551_v6 = vadd.f32 %v3350_v40, %v1523_v49  ;;  %v3484_v63 = vrot.slane %v2110_v20, %v2639_v35 }
 0x1f3   : > { %v3354_v52 = vpop.permute.xlu1 %1621  ;;  %v1849_v40 = vsub.f32 %v3458_v14, %v3455_v57  ;;  %v1850_v49 = vsub.f32 %v3461_v7, %v3455_v57 }
 0x1f4   : > { %v1626_v21 = vsub.f32 %v3399_v58, %v3354_v52  ;;  %v1627_v47 = vsub.f32 %v3402_v15, %v3354_v52 }
 0x1f6   : > { %v1630_v5 = vmin.f32 %v1585_v9, %v1626_v21 }
 0x1f8   : > { %v3356_v3 = vpop.permute.xlu1 %1592  ;;  %v1675_v9 = vmin.f32 %v1630_v5, %v1671_v30  ;;  %v1802_v30 = vpop.permute.xlu0 %1801 }
 0x1fd   : > { %v3358_v38 = vpop.permute.xlu1 %1662 }
 0x1fe   : > { %v1669_v13 = vsub.f32 %v3389_v41, %v3358_v38  ;;  %v1670_v19 = vsub.f32 %v3392_v2, %v3358_v38  ;;  %v1631_v38 = vmin.f32 %v1586_v54, %v1627_v47 }
 0x200   : > { %v1673_v10 = vmin.f32 %v1628_v59, %v1669_v13  ;;  %v1674_v21 = vmin.f32 %v1629_v55, %v1670_v19  ;;  %v1676_v51 = vmin.f32 %v1631_v38, %v1672_v43  ;;  %v3705_v43 = vmax.f32 %v3328_v31, %v3332_v17 }
 0x201   : > { %v3706_v19 = vmax.f32 %v3330_v4, %v3334_v62  ;;  %v1598_v31 = vadd.f32 %v3356_v3, %v3383_v28  ;;  %v1806_v17 = vsub.f32 %v3481_v23, %v1802_v30  ;;  %v1807_v4 = vsub.f32 %v3484_v63, %v1802_v30 }
 0x202   : > { %v3360_v50 = vpop.permute.xlu1 %1633  ;;  %v1554_v13 = vmax.f32 %v3705_v43, %v1550_v24  ;;  %v1718_v59 = vmin.f32 %v1673_v10, %v1714_v46  ;;  %v1719_v55 = vmin.f32 %v1674_v21, %v1715_v44 }
 0x203   : > { %v1555_v57 = vmax.f32 %v3706_v19, %v1551_v6  ;;  %v3707_v6 = vmax.f32 %v3324_v61, %v3340_v37  ;;  %v1640_v37 = vadd.f32 %v3360_v50, %v3399_v58 }
 0x204   : > { %v1599_v21 = vmax.f32 %v1554_v13, %v3417_v1 }
 0x206   : > { %v3362_v27 = vpop.permute.xlu1 %1637  ;;  %v1644_v19 = vmax.f32 %v1599_v21, %v1640_v37  ;;  %v1873_v37 = vld [vmem:[%s3626_s3] sm:$0xff] }
 0x207   : > { %v1643_v28 = vadd.f32 %v3362_v27, %v3402_v15 }
 0x20b   : > { %v3364_v39 = vpop.permute.xlu1 %1711 }
 0x20c   : > { %v1716_v47 = vsub.f32 %v3439_v42, %v3364_v39  ;;  %v1717_v11 = vsub.f32 %v3442_v18, %v3364_v39 }
 0x20e   : > { %v1720_v5 = vmin.f32 %v1675_v9, %v1716_v47  ;;  %v1721_v38 = vmin.f32 %v1676_v51, %v1717_v11  ;;  %v1600_v47 = vmax.f32 %v1555_v57, %v3420_v12 }
 0x210   : > { %v3368_v16 = vpop.permute.xlu1 %1678 }
 0x211   : > { %v1685_v12 = vadd.f32 %v3368_v16, %v3389_v41 }
 0x215   : > { %v3371_v26 = vpop.permute.xlu1 %1752 }
 0x216   : > { %v1759_v54 = vsub.f32 %v3469_v32, %v3371_v26  ;;  %v1760_v34 = vsub.f32 %v3472_v60, %v3371_v26 }
 0x218   : > { %v1763_v62 = vmin.f32 %v1718_v59, %v1759_v54  ;;  %v1764_v46 = vmin.f32 %v1719_v55, %v1760_v34 }
 0x219   : > { %v3377_v25 = vpop.permute.xlu1 %1756 }
 0x21a   : > { %v1761_v35 = vsub.f32 %v3469_v32, %v3377_v25  ;;  %v1762_v39 = vsub.f32 %v3472_v60, %v3377_v25  ;;  %v1597_v25 = vadd.f32 %v3356_v3, %v3380_v36  ;;  %v3708_v36 = vmax.f32 %v3326_v8, %v3342_v29 }
 0x21b   : > { %v1642_v3 = vadd.f32 %v3362_v27, %v3399_v58  ;;  %v1641_v8 = vadd.f32 %v3360_v50, %v3402_v15  ;;  %v1730_v50 = vadd.f32 %v3408_v33, %v3439_v42 }
 0x21c   : > { %v1765_v44 = vmin.f32 %v1720_v5, %v1761_v35  ;;  %v1766_v24 = vmin.f32 %v1721_v38, %v1762_v39  ;;  %v1557_v10 = vmax.f32 %v3708_v36, %v3396_v48  ;;  %v1686_v35 = vadd.f32 %v3368_v16, %v3392_v2 }
 0x21d   : > { %v1645_v57 = vmax.f32 %v1600_v47, %v1641_v8  ;;  %v1689_v5 = vmax.f32 %v1644_v19, %v1685_v12 }
 0x21e   : > { %v3410_v56 = vpop.permute.xlu1 %1727  ;;  %v1602_v61 = vmax.f32 %v1557_v10, %v1598_v31  ;;  %v1811_v48 = vmin.f32 %v1766_v24, %v1807_v4 }
 0x21f   : > { %v1732_v15 = vadd.f32 %v3410_v56, %v3439_v42  ;;  %v1733_v13 = vadd.f32 %v3410_v56, %v3442_v18  ;;  %v1690_v38 = vmax.f32 %v1645_v57, %v1686_v35  ;;  %v1731_v42 = vadd.f32 %v3408_v33, %v3442_v18 }
 0x220   : > { %v1647_v34 = vmax.f32 %v1602_v61, %v1643_v28  ;;  %v1734_v18 = vmax.f32 %v1689_v5, %v1730_v50 }
 0x222   : > { %v1692_v2 = vmax.f32 %v1647_v34, %v3453_v53 }
 0x223   : > { %v1798_v52 = vpop.permute.xlu1 %1797 }
 0x224   : > { %v1804_v26 = vsub.f32 %v3481_v23, %v1798_v52  ;;  %v1805_v20 = vsub.f32 %v3484_v63, %v1798_v52  ;;  %v1556_v52 = vmax.f32 %v3707_v6, %v3394_v45  ;;  %v1810_v45 = vmin.f32 %v1765_v44, %v1806_v17 }
 0x226   : > { %v1808_v11 = vmin.f32 %v1763_v62, %v1804_v26  ;;  %v1809_v9 = vmin.f32 %v1764_v46, %v1805_v20  ;;  %v1601_v51 = vmax.f32 %v1556_v52, %v1597_v25  ;;  %v1818_v26 = vpop.permute.xlu0 %1817  ;;  %v1737_v20 = vmax.f32 %v1692_v2, %v1733_v13 }
 0x227   : > { %v1822_v17 = vadd.f32 %v1818_v26, %v3481_v23  ;;  %v1823_v4 = vadd.f32 %v1818_v26, %v3484_v63  ;;  %v1735_v62 = vmax.f32 %v1690_v38, %v1731_v42 }
 0x228   : > { %v3486_v22 = vpop.permute.xlu1 %1768  ;;  %v1646_v1 = vmax.f32 %v1601_v51, %v1642_v3  ;;  %v1854_v39 = vmin.f32 %v1809_v9, %v1850_v49  ;;  %v1853_v30 = vmin.f32 %v1808_v11, %v1849_v40 }
 0x229   : > { %3704 = vst [vmem:[#allocation5_spill] sm:$0xff] %v3486_v22 }
 0x22a   : > { %v1691_v16 = vmax.f32 %v1646_v1, %v3450_v0 }
 0x22c   : > { %v1773_v22 = vpop.permute.xlu1 %1772  ;;  %v1736_v56 = vmax.f32 %v1691_v16, %v1732_v15 }
 0x22d   : > { %v1777_v40 = vadd.f32 %v1773_v22, %v3469_v32  ;;  %v1778_v49 = vadd.f32 %v1773_v22, %v3472_v60 }
 0x22f   : > { %v1781_v31 = vmax.f32 %v1736_v56, %v1777_v40  ;;  %v1782_v22 = vmax.f32 %v1737_v20, %v1778_v49  ;;  %v1880_v8 = vpop.permute.xlu0 %1879 }
 0x230   : > { %v3709_v0 = vld [vmem:[#allocation5_spill] sm:$0xff] }
 0x231   : > { %v1847_v29 = vpop.permute.xlu1 %1846  ;;  %v1775_v25 = vadd.f32 %v3709_v0, %v3469_v32  ;;  %v1776_v53 = vadd.f32 %v3709_v0, %v3472_v60  ;;  %v1826_v60 = vmax.f32 %v1781_v31, %v1822_v17  ;;  %v1827_v36 = vmax.f32 %v1782_v22, %v1823_v4 }
 0x232   : > { %v1851_v54 = vsub.f32 %v3458_v14, %v1847_v29  ;;  %v1852_v27 = vsub.f32 %v3461_v7, %v1847_v29 }
 0x233   : > { %v1779_v24 = vmax.f32 %v1734_v18, %v1775_v25  ;;  %v1780_v6 = vmax.f32 %v1735_v62, %v1776_v53 }
 0x234   : > { %v1856_v58 = vmin.f32 %v1811_v48, %v1852_v27  ;;  %v1855_v43 = vmin.f32 %v1810_v45, %v1851_v54 }
 0x236   : > { %v1814_v59 = vpop.permute.xlu1 %1813  ;;  %v2120_v41 = vpack.c.bf16 %v1856_v58, %v1854_v39  ;;  %v2122_v55 = vpack.c.bf16 %v1855_v43, %v1853_v30 }
 0x237   : > { %v1820_v46 = vadd.f32 %v1814_v59, %v3481_v23  ;;  %v1821_v44 = vadd.f32 %v1814_v59, %v3484_v63 }
 0x238   : > { %2121 = vmatprep.subr.bf16.mxu0 %v2120_v41  ;;  %2128 = vmatprep.subr.bf16.mxu1 %v2120_v41 }
 0x239   : > { %2123 = vmatpush1.bf16.msra.mxu0 %v2122_v55  ;;  %2130 = vmatpush1.bf16.msra.mxu1 %v2122_v55  ;;  %v1824_v3 = vmax.f32 %v1779_v24, %v1820_v46  ;;  %v1825_v28 = vmax.f32 %v1780_v6, %v1821_v44 }
 0x23b   : > { %v1859_v33 = vpop.permute.xlu1 %1858 }
 0x23c   : > { %v1865_v32 = vadd.f32 %v1859_v33, %v3458_v14  ;;  %v1866_v52 = vadd.f32 %v1859_v33, %v3461_v7 }
 0x23e   : > { %v1869_v11 = vmax.f32 %v1824_v3, %v1865_v32  ;;  %v1870_v23 = vmax.f32 %v1825_v28, %v1866_v52 }
 0x23f   : > { %v1863_v10 = vpop.permute.xlu1 %1862 }
 0x240   : > { %v1867_v21 = vadd.f32 %v1863_v10, %v3458_v14  ;;  %v1868_v47 = vadd.f32 %v1863_v10, %v3461_v7  ;;  %v1874_v14 = vld [vmem:[%s3626_s3 + $0x8] sm:$0xff] }
 0x242   : > { %v1871_v9 = vmax.f32 %v1826_v60, %v1867_v21  ;;  %v1872_v63 = vmax.f32 %v1827_v36, %v1868_v47 }
 0x244   : > { %v2124_v51 = vpack.c.bf16 %v1872_v63, %v1870_v23  ;;  %v2126_v61 = vpack.c.bf16 %v1871_v9, %v1869_v11  ;;  %v1885_v7 = vpop.permute.xlu1 %1884 }
 0x246   : > { %2125 = vmatprep.subr.bf16.mxu0 %v2124_v51  ;;  %2129 = vmatprep.subr.bf16.mxu1 %v2124_v51 }
 0x247   : > { %2127 = vmatpush1.bf16.msra.mxu0 %v2126_v61  ;;  %2131 = vmatpush1.bf16.msra.mxu1 %v2126_v61 }
 0x24a   : > { %2112 = vmatmul.mubr.msk.f32.vlgmr.msra.gmra.mrb[0].mxu0 %vm1887_vm0, %v1873_v37  ;;  %2113 = vmatmul.mubr.msk.f32.vlgmr.msra.gmra.mrb[0].mxu1 %vm1887_vm0, %v1874_v14 }
 0x31d   : > { %v1960_v29 = vpop.f32.mrb[0].mxu0  ;;  %v1966_v45 = vpop.f32.mrb[0].mxu1 }
 0x31e   : > { %v1961_v48 = vadd.f32 %v1960_v29, %v1880_v8  ;;  %v1967_v54 = vadd.f32 %v1966_v45, %v1885_v7  ;;  %v1962_v27 = vpop.f32.mrb[1].mxu0  ;;  %v1968_v1 = vpop.f32.mrb[1].mxu1 }
 0x31f   : > { %v1963_v34 = vadd.f32 %v1962_v27, %v1880_v8  ;;  %v1969_v12 = vadd.f32 %v1968_v1, %v1885_v7 }
 0x320   : > { %1971 = vst [vmem:[%s242_s8] sm:$0xff] %v1961_v48  ;;  %1973 = vst [vmem:[%s242_s8 + $0x10] sm:$0xff] %v1967_v54 }
 0x321   : > { %1972 = vst [vmem:[%s242_s8 + $0x8] sm:$0xff] %v1963_v34  ;;  %1974 = vst [vmem:[%s242_s8 + $0x18] sm:$0xff] %v1969_v12 }
 0x322   : > { %2333 = shalt.err (!%p2330_p5)
}
 0x323   : > { %s2334_s24 = scalar_lea.hbm %s3575_s13, 512  ;;  %s2338_s29 = scalar_lea.hbm %s3628_s5, 1024 }
 0x324   : > { %p2335_p6 = scmp.ne.s32.totalorder %s3575_s13, %s2334_s24  ;;  %p2339_p10 = scmp.lt.u32.totalorder %s3575_s13, %s3628_s5 }
 0x325   : > { %p2340_p11 = scmp.lt.u32.totalorder %s2338_s29, %s2334_s24  ;;  %p2342_p13 = scmp.lt.u32.totalorder %s2334_s24, %s3575_s13 }
 0x326   : > { %p2336_p7 = pnand %p2335_p6, %p2510_p4 }
 0x327   : > { %p2341_p12 = por %p2340_p11, %p2339_p10 }
 0x328   : > { %p2337_p9 = pneg %p2336_p7 }
 0x329   : > { %p2343_p0 = por %p2342_p13, %p2341_p12 }
 0x32b   : > { %p2344_p1 = pnand %p2343_p0, %p2337_p9 }
 0x32d   : > { %2347 = shalt.err (!%p2344_p1)
}
 0x32e   : > { %s2438_s10 = smov 256   ;;  %s2439_s11 = smov 16  }
 0x32f   : > { %2133 = dma.vmem_to_hbm [thread:$0]  (%p2510_p4), %s3570_s9, 512, %s3575_s13, %s3577_s21, %s2438_s10, %s2438_s10, %s2439_s11  }
 0x330 PF: > { %p2139_p2 = scmp.ge.s32.totalorder %s2398_s23, 2  ;;  %s2006_s12 = sand.u32 1, %s2378_s18  }
 0x331   : > { %s2007_s14 = scalar_lea.sflag [#allocation3], %s2006_s12 }
 0x332   : > { %p2136_p3 = pnand %p2139_p2, %p2517_p8 }
 0x334   : > { %2373 = dma.done.wait (!%p2136_p3), %s2007_s14, 512  }
 0x335   : > { %2375 = vsyncadd (!%p2136_p3), %s2007_s14, 4294966784  ;;  %s18_s23 = sadd.s32 1, %s2398_s23   ;;  %s3710_s18 = smov %s2382_s19 }
 0x336   : > { %p15_p5 = scmp.ge.s32.totalorder %s18_s23, 4   ;;  %s3711_s19 = smov %s2386_s20 }
 0x337   : > { %s3712_s20 = smov %s2523_s6  ;;  %s3713_s21 = smov %s2394_s22 }
 0x338   : > { %s3714_s22 = smov %s3716_s26  ;;  %17 = sbr.rel (!%p15_p5) target bundleno = 4 (0x4), region = 110 }
 0x33f   :  { %2012 = vsyncpa [#allocation3], 1 }
 0x340   :  { %2014 = vsyncpa [#allocation3 + $0x1], 1 }

</bundles_post_ra>
